<compile_context>
chip_gen: v5e
topology: v5e:2x2
jax: 0.10.0
libtpu: 0.0.40
codegen_flags: <defaults>
</compile_context>

<pallas_src>
import functools

import jax
import jax.numpy as jnp
from jax import lax
from jax.experimental import pallas as pl
from jax.experimental.pallas import tpu as pltpu


# ----------------------------------------------------------------------------
# Fused decoder kernel: all LSTM layers + final projection, everything in VMEM.
# Gate columns are packed in [i, f, o, g] order by the wrapper.
# ----------------------------------------------------------------------------
def _decoder_kernel(num_layers, S, B, H, x_ref, *args):
    # args = [wih_0, whh_0, b_0, ..., wih_{L-1}, whh_{L-1}, b_{L-1},
    #         w_out, b_out, y_ref]
    n_w = 3 * num_layers + 2
    w_refs = args[:n_w]
    y_ref = args[n_w]

    wihs = [w_refs[3 * l + 0][...] for l in range(num_layers)]    # (I_l, 4H)
    whhs = [w_refs[3 * l + 1][...] for l in range(num_layers)]    # (H, 4H)
    biases = [w_refs[3 * l + 2][...] for l in range(num_layers)]  # (1, 4H)
    w_out = w_refs[n_w - 2][...]                                  # (H, O_pad)
    b_out = w_refs[n_w - 1][...]                                  # (1, O_pad)

    x = x_ref[...]                                                # (S*B, I)

    # Layer-0 input projection hoisted over the whole sequence (independent
    # of the recurrence), with its S static slices pre-extracted so the
    # sublane extracts are off the critical path.
    gx0 = jnp.dot(x, wihs[0], preferred_element_type=jnp.float32) + biases[0]
    gx0_t = [gx0[t * B:(t + 1) * B, :] for t in range(S)]

    hs = [jnp.zeros((B, H), jnp.float32) for _ in range(num_layers)]
    cs = [jnp.zeros((B, H), jnp.float32) for _ in range(num_layers)]
    top_h = []

    # Fully-unrolled wavefront: layer l step t is emitted immediately after
    # layer l-1 step t; the per-layer chains are independent once h_{l-1,t}
    # is available, so the scheduler overlaps their MXU/VPU/EUP work.
    for t in range(S):
        for l in range(num_layers):
            if l == 0:
                g_in = gx0_t[t]
            else:
                # Per-step input projection for stacked layers (depends only
                # on h_{l-1,t}, not on this layer's own recurrence).
                g_in = (jnp.dot(hs[l - 1], wihs[l],
                                preferred_element_type=jnp.float32)
                        + biases[l])
            gates = g_in + jnp.dot(hs[l], whhs[l],
                                   preferred_element_type=jnp.float32)  # (B,4H)

            # Packed [i, f, o, g]: sigmoid over 3H cols, tanh over last H cols
            # -> half the transcendental elements vs. full-width sig AND tanh.
            sig = jax.nn.sigmoid(gates[:, 0:3 * H])
            i_g = sig[:, 0 * H:1 * H]
            f_g = sig[:, 1 * H:2 * H]
            o_g = sig[:, 2 * H:3 * H]
            g_g = jnp.tanh(gates[:, 3 * H:4 * H])

            c_new = f_g * cs[l] + i_g * g_g
            h_new = o_g * jnp.tanh(c_new)
            cs[l] = c_new
            hs[l] = h_new
        top_h.append(hs[num_layers - 1])

    # Register-resident activation slab -> one matmul + one lane-dense store
    # (O padded to 128 lanes in the wrapper, so the store is unmasked).
    acts = jnp.concatenate(top_h, axis=0)                         # (S*B, H)
    y_ref[...] = (jnp.dot(acts, w_out, preferred_element_type=jnp.float32)
                  + b_out)


# ----------------------------------------------------------------------------
# Decoder forward (matches the PyTorch module: LSTM(num_layers) -> Linear)
# ----------------------------------------------------------------------------
def decoder_forward(params, inputs):
    """inputs: (B, S, input_size) batch-first -> (B, S, output_size)."""
    inputs = inputs.astype(jnp.float32)
    B, S, I = inputs.shape
    num_layers = len(params["lstm"])
    H = params["lstm"][0]["w_hh"].shape[1]
    O = params["w_out"].shape[0]
    O_pad = ((O + 127) // 128) * 128            # lane-dense output width

    # PyTorch gate-row order is (i, f, g, o); repack columns to (i, f, o, g)
    # so the kernel runs sigmoid over the first 3H columns and tanh over the
    # last H.  All three tensors are permuted identically (required!).
    perm = jnp.concatenate([jnp.arange(0, H), jnp.arange(H, 2 * H),
                            jnp.arange(3 * H, 4 * H), jnp.arange(2 * H, 3 * H)])

    # Batch-first -> time-major, flattened so rows [t*B, (t+1)*B) are step t.
    x2d = jnp.transpose(inputs, (1, 0, 2)).reshape(S * B, I)

    args = [x2d]
    in_specs = [pl.BlockSpec((S * B, I), lambda i: (0, 0))]

    for layer in params["lstm"]:
        w_ih_t = jnp.asarray(layer["w_ih"], jnp.float32).T[:, perm]  # (I_l,4H)
        w_hh_t = jnp.asarray(layer["w_hh"], jnp.float32).T[:, perm]  # (H, 4H)
        bias = ((layer["b_ih"] + layer["b_hh"]).astype(jnp.float32)[perm]
                .reshape(1, 4 * H))
        args += [w_ih_t, w_hh_t, bias]
        in_specs += [
            pl.BlockSpec(w_ih_t.shape, lambda i: (0, 0)),
            pl.BlockSpec(w_hh_t.shape, lambda i: (0, 0)),
            pl.BlockSpec(bias.shape, lambda i: (0, 0)),
        ]

    # Pad the output projection to O_pad lanes (zeros); sliced back outside.
    w_out_p = jnp.zeros((H, O_pad), jnp.float32).at[:, :O].set(
        jnp.asarray(params["w_out"], jnp.float32).T)
    b_out_p = jnp.zeros((1, O_pad), jnp.float32).at[:, :O].set(
        jnp.asarray(params["b_out"], jnp.float32).reshape(1, O))
    args += [w_out_p, b_out_p]
    in_specs += [pl.BlockSpec((H, O_pad), lambda i: (0, 0)),
                 pl.BlockSpec((1, O_pad), lambda i: (0, 0))]

    kernel = functools.partial(_decoder_kernel, num_layers, S, B, H)

    y = pl.pallas_call(
        kernel,
        out_shape=jax.ShapeDtypeStruct((S * B, O_pad), jnp.float32),
        grid_spec=pltpu.PrefetchScalarGridSpec(
            num_scalar_prefetch=0,
            grid=(1,),
            in_specs=in_specs,
            out_specs=pl.BlockSpec((S * B, O_pad), lambda i: (0, 0)),
        ),
        compiler_params=pltpu.CompilerParams(
            dimension_semantics=("arbitrary",)),
    )(*args)

    y = y[:, :O].reshape(S, B, O)
    return jnp.transpose(y, (1, 0, 2))          # back to (B, S, O)


# ----------------------------------------------------------------------------
# Deterministic parameter init (shapes from nn.LSTM / nn.Linear __init__).
# ----------------------------------------------------------------------------
def init_params(key, input_size, hidden_dim, output_size, num_layers):
    layers = []
    k = key
    bound = float(1.0 / jnp.sqrt(hidden_dim))
    for l in range(num_layers):
        in_sz = input_size if l == 0 else hidden_dim
        k, k1, k2, k3, k4 = jax.random.split(k, 5)
        layers.append(dict(
            w_ih=jax.random.uniform(k1, (4 * hidden_dim, in_sz),
                                    jnp.float32, -bound, bound),
            w_hh=jax.random.uniform(k2, (4 * hidden_dim, hidden_dim),
                                    jnp.float32, -bound, bound),
            b_ih=jax.random.uniform(k3, (4 * hidden_dim,),
                                    jnp.float32, -bound, bound),
            b_hh=jax.random.uniform(k4, (4 * hidden_dim,),
                                    jnp.float32, -bound, bound),
        ))
    k, kw, kb = jax.random.split(k, 3)
    # kaiming_uniform_(mode='fan_in', nonlinearity='relu'): bound = sqrt(6/fan_in)
    wb = float(jnp.sqrt(6.0 / hidden_dim))
    w_out = jax.random.uniform(kw, (output_size, hidden_dim),
                               jnp.float32, -wb, wb)
    b_out = jax.random.uniform(kb, (output_size,), jnp.float32, -bound, bound)
    return dict(lstm=layers, w_out=w_out, b_out=b_out)


# ----------------------------------------------------------------------------
# Pure-JAX reference (lax.scan, standard PyTorch gate order) for correctness.
# ----------------------------------------------------------------------------
def reference_forward(params, inputs):
    x = jnp.transpose(inputs.astype(jnp.float32), (1, 0, 2))   # (S, B, I)
    for layer in params["lstm"]:
        H = layer["w_hh"].shape[1]
        wih_t, whh_t = layer["w_ih"].T, layer["w_hh"].T
        bias = layer["b_ih"] + layer["b_hh"]
        B = x.shape[1]

        def step(carry, x_t):
            h, c = carry
            g = x_t @ wih_t + h @ whh_t + bias
            i = jax.nn.sigmoid(g[:, 0 * H:1 * H])
            f = jax.nn.sigmoid(g[:, 1 * H:2 * H])
            gg = jnp.tanh(g[:, 2 * H:3 * H])
            o = jax.nn.sigmoid(g[:, 3 * H:4 * H])
            c = f * c + i * gg
            h = o * jnp.tanh(c)
            return (h, c), h

        init = (jnp.zeros((B, H), jnp.float32), jnp.zeros((B, H), jnp.float32))
        _, x = lax.scan(step, init, x)
    y = x @ params["w_out"].T + params["b_out"]
    return jnp.transpose(y, (1, 0, 2))


if __name__ == "__main__":
    # Small shapes consistent with the module: (batch, clause_num, feature)
    BATCH, SEQ = 2, 8
    INPUT_SIZE, HIDDEN_DIM, OUTPUT_SIZE, NUM_LAYERS = 24, 32, 5, 2

    key = jax.random.PRNGKey(0)
    k_params, k_x = jax.random.split(key)
    params = init_params(k_params, INPUT_SIZE, HIDDEN_DIM, OUTPUT_SIZE, NUM_LAYERS)
    x = jax.random.normal(k_x, (BATCH, SEQ, INPUT_SIZE), jnp.float32)

    fwd = jax.jit(decoder_forward)
    y = jax.block_until_ready(fwd(params, x))

    assert y.shape == (BATCH, SEQ, OUTPUT_SIZE), y.shape

    y_ref = jax.block_until_ready(reference_forward(params, x))
    assert jnp.allclose(y, y_ref, atol=1e-4, rtol=1e-4), \
        float(jnp.max(jnp.abs(y - y_ref)))

    print("KERNEL_OK")
</pallas_src>

<mosaic_0001>
module attributes {stable_mosaic.version = 11 : i64} {
  func.func @_decoder_kernel(%arg0: i32, %arg1: memref<16x24xf32, #tpu.memory_space<vmem>>, %arg2: memref<24x128xf32, #tpu.memory_space<vmem>>, %arg3: memref<32x128xf32, #tpu.memory_space<vmem>>, %arg4: memref<1x128xf32, #tpu.memory_space<vmem>>, %arg5: memref<32x128xf32, #tpu.memory_space<vmem>>, %arg6: memref<32x128xf32, #tpu.memory_space<vmem>>, %arg7: memref<1x128xf32, #tpu.memory_space<vmem>>, %arg8: memref<32x128xf32, #tpu.memory_space<vmem>>, %arg9: memref<1x128xf32, #tpu.memory_space<vmem>>, %arg10: memref<16x128xf32, #tpu.memory_space<vmem>>) attributes {dimension_semantics = [#tpu.dimension_semantics<arbitrary>], iteration_bounds = array<i64: 1>, scalar_prefetch = 0 : i64, scratch_operands = 0 : i64, tpu.core_type = #tpu.core_type<tc>, window_params = [{pipeline_mode = #tpu.pipeline_mode<synchronous>, transform_indices = @transform_0, window_bounds = array<i64: 16, 24>}, {pipeline_mode = #tpu.pipeline_mode<synchronous>, transform_indices = @transform_1, window_bounds = array<i64: 24, 128>}, {pipeline_mode = #tpu.pipeline_mode<synchronous>, transform_indices = @transform_2, window_bounds = array<i64: 32, 128>}, {pipeline_mode = #tpu.pipeline_mode<synchronous>, transform_indices = @transform_3, window_bounds = array<i64: 1, 128>}, {pipeline_mode = #tpu.pipeline_mode<synchronous>, transform_indices = @transform_4, window_bounds = array<i64: 32, 128>}, {pipeline_mode = #tpu.pipeline_mode<synchronous>, transform_indices = @transform_5, window_bounds = array<i64: 32, 128>}, {pipeline_mode = #tpu.pipeline_mode<synchronous>, transform_indices = @transform_6, window_bounds = array<i64: 1, 128>}, {pipeline_mode = #tpu.pipeline_mode<synchronous>, transform_indices = @transform_7, window_bounds = array<i64: 32, 128>}, {pipeline_mode = #tpu.pipeline_mode<synchronous>, transform_indices = @transform_8, window_bounds = array<i64: 1, 128>}, {pipeline_mode = #tpu.pipeline_mode<synchronous>, transform_indices = @transform_9, window_bounds = array<i64: 16, 128>}]} {
    %c0 = arith.constant 0 : index
    %c0_0 = arith.constant 0 : index
    %0 = vector.load %arg2[%c0, %c0_0] : memref<24x128xf32, #tpu.memory_space<vmem>>, vector<24x128xf32>
    %c0_1 = arith.constant 0 : index
    %c0_2 = arith.constant 0 : index
    %1 = vector.load %arg5[%c0_1, %c0_2] : memref<32x128xf32, #tpu.memory_space<vmem>>, vector<32x128xf32>
    %c0_3 = arith.constant 0 : index
    %c0_4 = arith.constant 0 : index
    %2 = vector.load %arg3[%c0_3, %c0_4] : memref<32x128xf32, #tpu.memory_space<vmem>>, vector<32x128xf32>
    %c0_5 = arith.constant 0 : index
    %c0_6 = arith.constant 0 : index
    %3 = vector.load %arg6[%c0_5, %c0_6] : memref<32x128xf32, #tpu.memory_space<vmem>>, vector<32x128xf32>
    %c0_7 = arith.constant 0 : index
    %c0_8 = arith.constant 0 : index
    %4 = vector.load %arg4[%c0_7, %c0_8] : memref<1x128xf32, #tpu.memory_space<vmem>>, vector<1x128xf32>
    %c0_9 = arith.constant 0 : index
    %c0_10 = arith.constant 0 : index
    %5 = vector.load %arg7[%c0_9, %c0_10] : memref<1x128xf32, #tpu.memory_space<vmem>>, vector<1x128xf32>
    %c0_11 = arith.constant 0 : index
    %c0_12 = arith.constant 0 : index
    %6 = vector.load %arg8[%c0_11, %c0_12] : memref<32x128xf32, #tpu.memory_space<vmem>>, vector<32x128xf32>
    %c0_13 = arith.constant 0 : index
    %c0_14 = arith.constant 0 : index
    %7 = vector.load %arg9[%c0_13, %c0_14] : memref<1x128xf32, #tpu.memory_space<vmem>>, vector<1x128xf32>
    %c0_15 = arith.constant 0 : index
    %c0_16 = arith.constant 0 : index
    %8 = vector.load %arg1[%c0_15, %c0_16] : memref<16x24xf32, #tpu.memory_space<vmem>>, vector<16x24xf32>
    %cst = arith.constant dense<0.000000e+00> : vector<16x128xf32>
    %9 = tpu.matmul %8, %0, %cst {dimension_numbers = #tpu.dot_dimension_numbers<[1], [0], [0], [1], [0, 0, 1, 1], [], []>} : vector<16x24xf32>, vector<24x128xf32>, vector<16x128xf32> -> vector<16x128xf32>
    %10 = vector.broadcast %4 : vector<1x128xf32> to vector<16x128xf32>
    %11 = arith.addf %9, %10 : vector<16x128xf32>
    %12 = vector.extract_strided_slice %11 {offsets = [0, 0], sizes = [2, 128], strides = [1, 1]} : vector<16x128xf32> to vector<2x128xf32>
    %13 = vector.extract_strided_slice %11 {offsets = [2, 0], sizes = [2, 128], strides = [1, 1]} : vector<16x128xf32> to vector<2x128xf32>
    %14 = vector.extract_strided_slice %11 {offsets = [4, 0], sizes = [2, 128], strides = [1, 1]} : vector<16x128xf32> to vector<2x128xf32>
    %15 = vector.extract_strided_slice %11 {offsets = [6, 0], sizes = [2, 128], strides = [1, 1]} : vector<16x128xf32> to vector<2x128xf32>
    %16 = vector.extract_strided_slice %11 {offsets = [8, 0], sizes = [2, 128], strides = [1, 1]} : vector<16x128xf32> to vector<2x128xf32>
    %17 = vector.extract_strided_slice %11 {offsets = [10, 0], sizes = [2, 128], strides = [1, 1]} : vector<16x128xf32> to vector<2x128xf32>
    %18 = vector.extract_strided_slice %11 {offsets = [12, 0], sizes = [2, 128], strides = [1, 1]} : vector<16x128xf32> to vector<2x128xf32>
    %19 = vector.extract_strided_slice %11 {offsets = [14, 0], sizes = [2, 128], strides = [1, 1]} : vector<16x128xf32> to vector<2x128xf32>
    %cst_17 = arith.constant 0.000000e+00 : f32
    %20 = vector.broadcast %cst_17 : f32 to vector<2x32xf32>
    %cst_18 = arith.constant 0.000000e+00 : f32
    %21 = vector.broadcast %cst_18 : f32 to vector<2x32xf32>
    %cst_19 = arith.constant 0.000000e+00 : f32
    %22 = vector.broadcast %cst_19 : f32 to vector<2x32xf32>
    %cst_20 = arith.constant 0.000000e+00 : f32
    %23 = vector.broadcast %cst_20 : f32 to vector<2x32xf32>
    %cst_21 = arith.constant dense<0.000000e+00> : vector<2x128xf32>
    %24 = tpu.matmul %20, %2, %cst_21 {dimension_numbers = #tpu.dot_dimension_numbers<[1], [0], [0], [1], [0, 0, 1, 1], [], []>} : vector<2x32xf32>, vector<32x128xf32>, vector<2x128xf32> -> vector<2x128xf32>
    %25 = arith.addf %12, %24 : vector<2x128xf32>
    %26 = vector.extract_strided_slice %25 {offsets = [0, 0], sizes = [2, 96], strides = [1, 1]} : vector<2x128xf32> to vector<2x96xf32>
    %27 = arith.negf %26 : vector<2x96xf32>
    %28 = math.exp %27 : vector<2x96xf32>
    %cst_22 = arith.constant 1.000000e+00 : f32
    %29 = vector.broadcast %cst_22 : f32 to vector<2x96xf32>
    %30 = arith.addf %29, %28 : vector<2x96xf32>
    %31 = arith.divf %29, %30 : vector<2x96xf32>
    %32 = vector.extract_strided_slice %31 {offsets = [0, 0], sizes = [2, 32], strides = [1, 1]} : vector<2x96xf32> to vector<2x32xf32>
    %33 = vector.extract_strided_slice %31 {offsets = [0, 32], sizes = [2, 32], strides = [1, 1]} : vector<2x96xf32> to vector<2x32xf32>
    %34 = vector.extract_strided_slice %31 {offsets = [0, 64], sizes = [2, 32], strides = [1, 1]} : vector<2x96xf32> to vector<2x32xf32>
    %35 = vector.extract_strided_slice %25 {offsets = [0, 96], sizes = [2, 32], strides = [1, 1]} : vector<2x128xf32> to vector<2x32xf32>
    %36 = math.tanh %35 : vector<2x32xf32>
    %37 = arith.mulf %33, %22 : vector<2x32xf32>
    %38 = arith.mulf %32, %36 : vector<2x32xf32>
    %39 = arith.addf %37, %38 : vector<2x32xf32>
    %40 = math.tanh %39 : vector<2x32xf32>
    %41 = arith.mulf %34, %40 : vector<2x32xf32>
    %cst_23 = arith.constant dense<0.000000e+00> : vector<2x128xf32>
    %42 = tpu.matmul %41, %1, %cst_23 {dimension_numbers = #tpu.dot_dimension_numbers<[1], [0], [0], [1], [0, 0, 1, 1], [], []>} : vector<2x32xf32>, vector<32x128xf32>, vector<2x128xf32> -> vector<2x128xf32>
    %43 = vector.broadcast %5 : vector<1x128xf32> to vector<2x128xf32>
    %44 = arith.addf %42, %43 : vector<2x128xf32>
    %cst_24 = arith.constant dense<0.000000e+00> : vector<2x128xf32>
    %45 = tpu.matmul %21, %3, %cst_24 {dimension_numbers = #tpu.dot_dimension_numbers<[1], [0], [0], [1], [0, 0, 1, 1], [], []>} : vector<2x32xf32>, vector<32x128xf32>, vector<2x128xf32> -> vector<2x128xf32>
    %46 = arith.addf %44, %45 : vector<2x128xf32>
    %47 = vector.extract_strided_slice %46 {offsets = [0, 0], sizes = [2, 96], strides = [1, 1]} : vector<2x128xf32> to vector<2x96xf32>
    %48 = arith.negf %47 : vector<2x96xf32>
    %49 = math.exp %48 : vector<2x96xf32>
    %cst_25 = arith.constant 1.000000e+00 : f32
    %50 = vector.broadcast %cst_25 : f32 to vector<2x96xf32>
    %51 = arith.addf %50, %49 : vector<2x96xf32>
    %52 = arith.divf %50, %51 : vector<2x96xf32>
    %53 = vector.extract_strided_slice %52 {offsets = [0, 0], sizes = [2, 32], strides = [1, 1]} : vector<2x96xf32> to vector<2x32xf32>
    %54 = vector.extract_strided_slice %52 {offsets = [0, 32], sizes = [2, 32], strides = [1, 1]} : vector<2x96xf32> to vector<2x32xf32>
    %55 = vector.extract_strided_slice %52 {offsets = [0, 64], sizes = [2, 32], strides = [1, 1]} : vector<2x96xf32> to vector<2x32xf32>
    %56 = vector.extract_strided_slice %46 {offsets = [0, 96], sizes = [2, 32], strides = [1, 1]} : vector<2x128xf32> to vector<2x32xf32>
    %57 = math.tanh %56 : vector<2x32xf32>
    %58 = arith.mulf %54, %23 : vector<2x32xf32>
    %59 = arith.mulf %53, %57 : vector<2x32xf32>
    %60 = arith.addf %58, %59 : vector<2x32xf32>
    %61 = math.tanh %60 : vector<2x32xf32>
    %62 = arith.mulf %55, %61 : vector<2x32xf32>
    %cst_26 = arith.constant dense<0.000000e+00> : vector<2x128xf32>
    %63 = tpu.matmul %41, %2, %cst_26 {dimension_numbers = #tpu.dot_dimension_numbers<[1], [0], [0], [1], [0, 0, 1, 1], [], []>} : vector<2x32xf32>, vector<32x128xf32>, vector<2x128xf32> -> vector<2x128xf32>
    %64 = arith.addf %13, %63 : vector<2x128xf32>
    %65 = vector.extract_strided_slice %64 {offsets = [0, 0], sizes = [2, 96], strides = [1, 1]} : vector<2x128xf32> to vector<2x96xf32>
    %66 = arith.negf %65 : vector<2x96xf32>
    %67 = math.exp %66 : vector<2x96xf32>
    %cst_27 = arith.constant 1.000000e+00 : f32
    %68 = vector.broadcast %cst_27 : f32 to vector<2x96xf32>
    %69 = arith.addf %68, %67 : vector<2x96xf32>
    %70 = arith.divf %68, %69 : vector<2x96xf32>
    %71 = vector.extract_strided_slice %70 {offsets = [0, 0], sizes = [2, 32], strides = [1, 1]} : vector<2x96xf32> to vector<2x32xf32>
    %72 = vector.extract_strided_slice %70 {offsets = [0, 32], sizes = [2, 32], strides = [1, 1]} : vector<2x96xf32> to vector<2x32xf32>
    %73 = vector.extract_strided_slice %70 {offsets = [0, 64], sizes = [2, 32], strides = [1, 1]} : vector<2x96xf32> to vector<2x32xf32>
    %74 = vector.extract_strided_slice %64 {offsets = [0, 96], sizes = [2, 32], strides = [1, 1]} : vector<2x128xf32> to vector<2x32xf32>
    %75 = math.tanh %74 : vector<2x32xf32>
    %76 = arith.mulf %72, %39 : vector<2x32xf32>
    %77 = arith.mulf %71, %75 : vector<2x32xf32>
    %78 = arith.addf %76, %77 : vector<2x32xf32>
    %79 = math.tanh %78 : vector<2x32xf32>
    %80 = arith.mulf %73, %79 : vector<2x32xf32>
    %cst_28 = arith.constant dense<0.000000e+00> : vector<2x128xf32>
    %81 = tpu.matmul %80, %1, %cst_28 {dimension_numbers = #tpu.dot_dimension_numbers<[1], [0], [0], [1], [0, 0, 1, 1], [], []>} : vector<2x32xf32>, vector<32x128xf32>, vector<2x128xf32> -> vector<2x128xf32>
    %82 = vector.broadcast %5 : vector<1x128xf32> to vector<2x128xf32>
    %83 = arith.addf %81, %82 : vector<2x128xf32>
    %cst_29 = arith.constant dense<0.000000e+00> : vector<2x128xf32>
    %84 = tpu.matmul %62, %3, %cst_29 {dimension_numbers = #tpu.dot_dimension_numbers<[1], [0], [0], [1], [0, 0, 1, 1], [], []>} : vector<2x32xf32>, vector<32x128xf32>, vector<2x128xf32> -> vector<2x128xf32>
    %85 = arith.addf %83, %84 : vector<2x128xf32>
    %86 = vector.extract_strided_slice %85 {offsets = [0, 0], sizes = [2, 96], strides = [1, 1]} : vector<2x128xf32> to vector<2x96xf32>
    %87 = arith.negf %86 : vector<2x96xf32>
    %88 = math.exp %87 : vector<2x96xf32>
    %cst_30 = arith.constant 1.000000e+00 : f32
    %89 = vector.broadcast %cst_30 : f32 to vector<2x96xf32>
    %90 = arith.addf %89, %88 : vector<2x96xf32>
    %91 = arith.divf %89, %90 : vector<2x96xf32>
    %92 = vector.extract_strided_slice %91 {offsets = [0, 0], sizes = [2, 32], strides = [1, 1]} : vector<2x96xf32> to vector<2x32xf32>
    %93 = vector.extract_strided_slice %91 {offsets = [0, 32], sizes = [2, 32], strides = [1, 1]} : vector<2x96xf32> to vector<2x32xf32>
    %94 = vector.extract_strided_slice %91 {offsets = [0, 64], sizes = [2, 32], strides = [1, 1]} : vector<2x96xf32> to vector<2x32xf32>
    %95 = vector.extract_strided_slice %85 {offsets = [0, 96], sizes = [2, 32], strides = [1, 1]} : vector<2x128xf32> to vector<2x32xf32>
    %96 = math.tanh %95 : vector<2x32xf32>
    %97 = arith.mulf %93, %60 : vector<2x32xf32>
    %98 = arith.mulf %92, %96 : vector<2x32xf32>
    %99 = arith.addf %97, %98 : vector<2x32xf32>
    %100 = math.tanh %99 : vector<2x32xf32>
    %101 = arith.mulf %94, %100 : vector<2x32xf32>
    %cst_31 = arith.constant dense<0.000000e+00> : vector<2x128xf32>
    %102 = tpu.matmul %80, %2, %cst_31 {dimension_numbers = #tpu.dot_dimension_numbers<[1], [0], [0], [1], [0, 0, 1, 1], [], []>} : vector<2x32xf32>, vector<32x128xf32>, vector<2x128xf32> -> vector<2x128xf32>
    %103 = arith.addf %14, %102 : vector<2x128xf32>
    %104 = vector.extract_strided_slice %103 {offsets = [0, 0], sizes = [2, 96], strides = [1, 1]} : vector<2x128xf32> to vector<2x96xf32>
    %105 = arith.negf %104 : vector<2x96xf32>
    %106 = math.exp %105 : vector<2x96xf32>
    %cst_32 = arith.constant 1.000000e+00 : f32
    %107 = vector.broadcast %cst_32 : f32 to vector<2x96xf32>
    %108 = arith.addf %107, %106 : vector<2x96xf32>
    %109 = arith.divf %107, %108 : vector<2x96xf32>
    %110 = vector.extract_strided_slice %109 {offsets = [0, 0], sizes = [2, 32], strides = [1, 1]} : vector<2x96xf32> to vector<2x32xf32>
    %111 = vector.extract_strided_slice %109 {offsets = [0, 32], sizes = [2, 32], strides = [1, 1]} : vector<2x96xf32> to vector<2x32xf32>
    %112 = vector.extract_strided_slice %109 {offsets = [0, 64], sizes = [2, 32], strides = [1, 1]} : vector<2x96xf32> to vector<2x32xf32>
    %113 = vector.extract_strided_slice %103 {offsets = [0, 96], sizes = [2, 32], strides = [1, 1]} : vector<2x128xf32> to vector<2x32xf32>
    %114 = math.tanh %113 : vector<2x32xf32>
    %115 = arith.mulf %111, %78 : vector<2x32xf32>
    %116 = arith.mulf %110, %114 : vector<2x32xf32>
    %117 = arith.addf %115, %116 : vector<2x32xf32>
    %118 = math.tanh %117 : vector<2x32xf32>
    %119 = arith.mulf %112, %118 : vector<2x32xf32>
    %cst_33 = arith.constant dense<0.000000e+00> : vector<2x128xf32>
    %120 = tpu.matmul %119, %1, %cst_33 {dimension_numbers = #tpu.dot_dimension_numbers<[1], [0], [0], [1], [0, 0, 1, 1], [], []>} : vector<2x32xf32>, vector<32x128xf32>, vector<2x128xf32> -> vector<2x128xf32>
    %121 = vector.broadcast %5 : vector<1x128xf32> to vector<2x128xf32>
    %122 = arith.addf %120, %121 : vector<2x128xf32>
    %cst_34 = arith.constant dense<0.000000e+00> : vector<2x128xf32>
    %123 = tpu.matmul %101, %3, %cst_34 {dimension_numbers = #tpu.dot_dimension_numbers<[1], [0], [0], [1], [0, 0, 1, 1], [], []>} : vector<2x32xf32>, vector<32x128xf32>, vector<2x128xf32> -> vector<2x128xf32>
    %124 = arith.addf %122, %123 : vector<2x128xf32>
    %125 = vector.extract_strided_slice %124 {offsets = [0, 0], sizes = [2, 96], strides = [1, 1]} : vector<2x128xf32> to vector<2x96xf32>
    %126 = arith.negf %125 : vector<2x96xf32>
    %127 = math.exp %126 : vector<2x96xf32>
    %cst_35 = arith.constant 1.000000e+00 : f32
    %128 = vector.broadcast %cst_35 : f32 to vector<2x96xf32>
    %129 = arith.addf %128, %127 : vector<2x96xf32>
    %130 = arith.divf %128, %129 : vector<2x96xf32>
    %131 = vector.extract_strided_slice %130 {offsets = [0, 0], sizes = [2, 32], strides = [1, 1]} : vector<2x96xf32> to vector<2x32xf32>
    %132 = vector.extract_strided_slice %130 {offsets = [0, 32], sizes = [2, 32], strides = [1, 1]} : vector<2x96xf32> to vector<2x32xf32>
    %133 = vector.extract_strided_slice %130 {offsets = [0, 64], sizes = [2, 32], strides = [1, 1]} : vector<2x96xf32> to vector<2x32xf32>
    %134 = vector.extract_strided_slice %124 {offsets = [0, 96], sizes = [2, 32], strides = [1, 1]} : vector<2x128xf32> to vector<2x32xf32>
    %135 = math.tanh %134 : vector<2x32xf32>
    %136 = arith.mulf %132, %99 : vector<2x32xf32>
    %137 = arith.mulf %131, %135 : vector<2x32xf32>
    %138 = arith.addf %136, %137 : vector<2x32xf32>
    %139 = math.tanh %138 : vector<2x32xf32>
    %140 = arith.mulf %133, %139 : vector<2x32xf32>
    %cst_36 = arith.constant dense<0.000000e+00> : vector<2x128xf32>
    %141 = tpu.matmul %119, %2, %cst_36 {dimension_numbers = #tpu.dot_dimension_numbers<[1], [0], [0], [1], [0, 0, 1, 1], [], []>} : vector<2x32xf32>, vector<32x128xf32>, vector<2x128xf32> -> vector<2x128xf32>
    %142 = arith.addf %15, %141 : vector<2x128xf32>
    %143 = vector.extract_strided_slice %142 {offsets = [0, 0], sizes = [2, 96], strides = [1, 1]} : vector<2x128xf32> to vector<2x96xf32>
    %144 = arith.negf %143 : vector<2x96xf32>
    %145 = math.exp %144 : vector<2x96xf32>
    %cst_37 = arith.constant 1.000000e+00 : f32
    %146 = vector.broadcast %cst_37 : f32 to vector<2x96xf32>
    %147 = arith.addf %146, %145 : vector<2x96xf32>
    %148 = arith.divf %146, %147 : vector<2x96xf32>
    %149 = vector.extract_strided_slice %148 {offsets = [0, 0], sizes = [2, 32], strides = [1, 1]} : vector<2x96xf32> to vector<2x32xf32>
    %150 = vector.extract_strided_slice %148 {offsets = [0, 32], sizes = [2, 32], strides = [1, 1]} : vector<2x96xf32> to vector<2x32xf32>
    %151 = vector.extract_strided_slice %148 {offsets = [0, 64], sizes = [2, 32], strides = [1, 1]} : vector<2x96xf32> to vector<2x32xf32>
    %152 = vector.extract_strided_slice %142 {offsets = [0, 96], sizes = [2, 32], strides = [1, 1]} : vector<2x128xf32> to vector<2x32xf32>
    %153 = math.tanh %152 : vector<2x32xf32>
    %154 = arith.mulf %150, %117 : vector<2x32xf32>
    %155 = arith.mulf %149, %153 : vector<2x32xf32>
    %156 = arith.addf %154, %155 : vector<2x32xf32>
    %157 = math.tanh %156 : vector<2x32xf32>
    %158 = arith.mulf %151, %157 : vector<2x32xf32>
    %cst_38 = arith.constant dense<0.000000e+00> : vector<2x128xf32>
    %159 = tpu.matmul %158, %1, %cst_38 {dimension_numbers = #tpu.dot_dimension_numbers<[1], [0], [0], [1], [0, 0, 1, 1], [], []>} : vector<2x32xf32>, vector<32x128xf32>, vector<2x128xf32> -> vector<2x128xf32>
    %160 = vector.broadcast %5 : vector<1x128xf32> to vector<2x128xf32>
    %161 = arith.addf %159, %160 : vector<2x128xf32>
    %cst_39 = arith.constant dense<0.000000e+00> : vector<2x128xf32>
    %162 = tpu.matmul %140, %3, %cst_39 {dimension_numbers = #tpu.dot_dimension_numbers<[1], [0], [0], [1], [0, 0, 1, 1], [], []>} : vector<2x32xf32>, vector<32x128xf32>, vector<2x128xf32> -> vector<2x128xf32>
    %163 = arith.addf %161, %162 : vector<2x128xf32>
    %164 = vector.extract_strided_slice %163 {offsets = [0, 0], sizes = [2, 96], strides = [1, 1]} : vector<2x128xf32> to vector<2x96xf32>
    %165 = arith.negf %164 : vector<2x96xf32>
    %166 = math.exp %165 : vector<2x96xf32>
    %cst_40 = arith.constant 1.000000e+00 : f32
    %167 = vector.broadcast %cst_40 : f32 to vector<2x96xf32>
    %168 = arith.addf %167, %166 : vector<2x96xf32>
    %169 = arith.divf %167, %168 : vector<2x96xf32>
    %170 = vector.extract_strided_slice %169 {offsets = [0, 0], sizes = [2, 32], strides = [1, 1]} : vector<2x96xf32> to vector<2x32xf32>
    %171 = vector.extract_strided_slice %169 {offsets = [0, 32], sizes = [2, 32], strides = [1, 1]} : vector<2x96xf32> to vector<2x32xf32>
    %172 = vector.extract_strided_slice %169 {offsets = [0, 64], sizes = [2, 32], strides = [1, 1]} : vector<2x96xf32> to vector<2x32xf32>
    %173 = vector.extract_strided_slice %163 {offsets = [0, 96], sizes = [2, 32], strides = [1, 1]} : vector<2x128xf32> to vector<2x32xf32>
    %174 = math.tanh %173 : vector<2x32xf32>
    %175 = arith.mulf %171, %138 : vector<2x32xf32>
    %176 = arith.mulf %170, %174 : vector<2x32xf32>
    %177 = arith.addf %175, %176 : vector<2x32xf32>
    %178 = math.tanh %177 : vector<2x32xf32>
    %179 = arith.mulf %172, %178 : vector<2x32xf32>
    %cst_41 = arith.constant dense<0.000000e+00> : vector<2x128xf32>
    %180 = tpu.matmul %158, %2, %cst_41 {dimension_numbers = #tpu.dot_dimension_numbers<[1], [0], [0], [1], [0, 0, 1, 1], [], []>} : vector<2x32xf32>, vector<32x128xf32>, vector<2x128xf32> -> vector<2x128xf32>
    %181 = arith.addf %16, %180 : vector<2x128xf32>
    %182 = vector.extract_strided_slice %181 {offsets = [0, 0], sizes = [2, 96], strides = [1, 1]} : vector<2x128xf32> to vector<2x96xf32>
    %183 = arith.negf %182 : vector<2x96xf32>
    %184 = math.exp %183 : vector<2x96xf32>
    %cst_42 = arith.constant 1.000000e+00 : f32
    %185 = vector.broadcast %cst_42 : f32 to vector<2x96xf32>
    %186 = arith.addf %185, %184 : vector<2x96xf32>
    %187 = arith.divf %185, %186 : vector<2x96xf32>
    %188 = vector.extract_strided_slice %187 {offsets = [0, 0], sizes = [2, 32], strides = [1, 1]} : vector<2x96xf32> to vector<2x32xf32>
    %189 = vector.extract_strided_slice %187 {offsets = [0, 32], sizes = [2, 32], strides = [1, 1]} : vector<2x96xf32> to vector<2x32xf32>
    %190 = vector.extract_strided_slice %187 {offsets = [0, 64], sizes = [2, 32], strides = [1, 1]} : vector<2x96xf32> to vector<2x32xf32>
    %191 = vector.extract_strided_slice %181 {offsets = [0, 96], sizes = [2, 32], strides = [1, 1]} : vector<2x128xf32> to vector<2x32xf32>
    %192 = math.tanh %191 : vector<2x32xf32>
    %193 = arith.mulf %189, %156 : vector<2x32xf32>
    %194 = arith.mulf %188, %192 : vector<2x32xf32>
    %195 = arith.addf %193, %194 : vector<2x32xf32>
    %196 = math.tanh %195 : vector<2x32xf32>
    %197 = arith.mulf %190, %196 : vector<2x32xf32>
    %cst_43 = arith.constant dense<0.000000e+00> : vector<2x128xf32>
    %198 = tpu.matmul %197, %1, %cst_43 {dimension_numbers = #tpu.dot_dimension_numbers<[1], [0], [0], [1], [0, 0, 1, 1], [], []>} : vector<2x32xf32>, vector<32x128xf32>, vector<2x128xf32> -> vector<2x128xf32>
    %199 = vector.broadcast %5 : vector<1x128xf32> to vector<2x128xf32>
    %200 = arith.addf %198, %199 : vector<2x128xf32>
    %cst_44 = arith.constant dense<0.000000e+00> : vector<2x128xf32>
    %201 = tpu.matmul %179, %3, %cst_44 {dimension_numbers = #tpu.dot_dimension_numbers<[1], [0], [0], [1], [0, 0, 1, 1], [], []>} : vector<2x32xf32>, vector<32x128xf32>, vector<2x128xf32> -> vector<2x128xf32>
    %202 = arith.addf %200, %201 : vector<2x128xf32>
    %203 = vector.extract_strided_slice %202 {offsets = [0, 0], sizes = [2, 96], strides = [1, 1]} : vector<2x128xf32> to vector<2x96xf32>
    %204 = arith.negf %203 : vector<2x96xf32>
    %205 = math.exp %204 : vector<2x96xf32>
    %cst_45 = arith.constant 1.000000e+00 : f32
    %206 = vector.broadcast %cst_45 : f32 to vector<2x96xf32>
    %207 = arith.addf %206, %205 : vector<2x96xf32>
    %208 = arith.divf %206, %207 : vector<2x96xf32>
    %209 = vector.extract_strided_slice %208 {offsets = [0, 0], sizes = [2, 32], strides = [1, 1]} : vector<2x96xf32> to vector<2x32xf32>
    %210 = vector.extract_strided_slice %208 {offsets = [0, 32], sizes = [2, 32], strides = [1, 1]} : vector<2x96xf32> to vector<2x32xf32>
    %211 = vector.extract_strided_slice %208 {offsets = [0, 64], sizes = [2, 32], strides = [1, 1]} : vector<2x96xf32> to vector<2x32xf32>
    %212 = vector.extract_strided_slice %202 {offsets = [0, 96], sizes = [2, 32], strides = [1, 1]} : vector<2x128xf32> to vector<2x32xf32>
    %213 = math.tanh %212 : vector<2x32xf32>
    %214 = arith.mulf %210, %177 : vector<2x32xf32>
    %215 = arith.mulf %209, %213 : vector<2x32xf32>
    %216 = arith.addf %214, %215 : vector<2x32xf32>
    %217 = math.tanh %216 : vector<2x32xf32>
    %218 = arith.mulf %211, %217 : vector<2x32xf32>
    %cst_46 = arith.constant dense<0.000000e+00> : vector<2x128xf32>
    %219 = tpu.matmul %197, %2, %cst_46 {dimension_numbers = #tpu.dot_dimension_numbers<[1], [0], [0], [1], [0, 0, 1, 1], [], []>} : vector<2x32xf32>, vector<32x128xf32>, vector<2x128xf32> -> vector<2x128xf32>
    %220 = arith.addf %17, %219 : vector<2x128xf32>
    %221 = vector.extract_strided_slice %220 {offsets = [0, 0], sizes = [2, 96], strides = [1, 1]} : vector<2x128xf32> to vector<2x96xf32>
    %222 = arith.negf %221 : vector<2x96xf32>
    %223 = math.exp %222 : vector<2x96xf32>
    %cst_47 = arith.constant 1.000000e+00 : f32
    %224 = vector.broadcast %cst_47 : f32 to vector<2x96xf32>
    %225 = arith.addf %224, %223 : vector<2x96xf32>
    %226 = arith.divf %224, %225 : vector<2x96xf32>
    %227 = vector.extract_strided_slice %226 {offsets = [0, 0], sizes = [2, 32], strides = [1, 1]} : vector<2x96xf32> to vector<2x32xf32>
    %228 = vector.extract_strided_slice %226 {offsets = [0, 32], sizes = [2, 32], strides = [1, 1]} : vector<2x96xf32> to vector<2x32xf32>
    %229 = vector.extract_strided_slice %226 {offsets = [0, 64], sizes = [2, 32], strides = [1, 1]} : vector<2x96xf32> to vector<2x32xf32>
    %230 = vector.extract_strided_slice %220 {offsets = [0, 96], sizes = [2, 32], strides = [1, 1]} : vector<2x128xf32> to vector<2x32xf32>
    %231 = math.tanh %230 : vector<2x32xf32>
    %232 = arith.mulf %228, %195 : vector<2x32xf32>
    %233 = arith.mulf %227, %231 : vector<2x32xf32>
    %234 = arith.addf %232, %233 : vector<2x32xf32>
    %235 = math.tanh %234 : vector<2x32xf32>
    %236 = arith.mulf %229, %235 : vector<2x32xf32>
    %cst_48 = arith.constant dense<0.000000e+00> : vector<2x128xf32>
    %237 = tpu.matmul %236, %1, %cst_48 {dimension_numbers = #tpu.dot_dimension_numbers<[1], [0], [0], [1], [0, 0, 1, 1], [], []>} : vector<2x32xf32>, vector<32x128xf32>, vector<2x128xf32> -> vector<2x128xf32>
    %238 = vector.broadcast %5 : vector<1x128xf32> to vector<2x128xf32>
    %239 = arith.addf %237, %238 : vector<2x128xf32>
    %cst_49 = arith.constant dense<0.000000e+00> : vector<2x128xf32>
    %240 = tpu.matmul %218, %3, %cst_49 {dimension_numbers = #tpu.dot_dimension_numbers<[1], [0], [0], [1], [0, 0, 1, 1], [], []>} : vector<2x32xf32>, vector<32x128xf32>, vector<2x128xf32> -> vector<2x128xf32>
    %241 = arith.addf %239, %240 : vector<2x128xf32>
    %242 = vector.extract_strided_slice %241 {offsets = [0, 0], sizes = [2, 96], strides = [1, 1]} : vector<2x128xf32> to vector<2x96xf32>
    %243 = arith.negf %242 : vector<2x96xf32>
    %244 = math.exp %243 : vector<2x96xf32>
    %cst_50 = arith.constant 1.000000e+00 : f32
    %245 = vector.broadcast %cst_50 : f32 to vector<2x96xf32>
    %246 = arith.addf %245, %244 : vector<2x96xf32>
    %247 = arith.divf %245, %246 : vector<2x96xf32>
    %248 = vector.extract_strided_slice %247 {offsets = [0, 0], sizes = [2, 32], strides = [1, 1]} : vector<2x96xf32> to vector<2x32xf32>
    %249 = vector.extract_strided_slice %247 {offsets = [0, 32], sizes = [2, 32], strides = [1, 1]} : vector<2x96xf32> to vector<2x32xf32>
    %250 = vector.extract_strided_slice %247 {offsets = [0, 64], sizes = [2, 32], strides = [1, 1]} : vector<2x96xf32> to vector<2x32xf32>
    %251 = vector.extract_strided_slice %241 {offsets = [0, 96], sizes = [2, 32], strides = [1, 1]} : vector<2x128xf32> to vector<2x32xf32>
    %252 = math.tanh %251 : vector<2x32xf32>
    %253 = arith.mulf %249, %216 : vector<2x32xf32>
    %254 = arith.mulf %248, %252 : vector<2x32xf32>
    %255 = arith.addf %253, %254 : vector<2x32xf32>
    %256 = math.tanh %255 : vector<2x32xf32>
    %257 = arith.mulf %250, %256 : vector<2x32xf32>
    %cst_51 = arith.constant dense<0.000000e+00> : vector<2x128xf32>
    %258 = tpu.matmul %236, %2, %cst_51 {dimension_numbers = #tpu.dot_dimension_numbers<[1], [0], [0], [1], [0, 0, 1, 1], [], []>} : vector<2x32xf32>, vector<32x128xf32>, vector<2x128xf32> -> vector<2x128xf32>
    %259 = arith.addf %18, %258 : vector<2x128xf32>
    %260 = vector.extract_strided_slice %259 {offsets = [0, 0], sizes = [2, 96], strides = [1, 1]} : vector<2x128xf32> to vector<2x96xf32>
    %261 = arith.negf %260 : vector<2x96xf32>
    %262 = math.exp %261 : vector<2x96xf32>
    %cst_52 = arith.constant 1.000000e+00 : f32
    %263 = vector.broadcast %cst_52 : f32 to vector<2x96xf32>
    %264 = arith.addf %263, %262 : vector<2x96xf32>
    %265 = arith.divf %263, %264 : vector<2x96xf32>
    %266 = vector.extract_strided_slice %265 {offsets = [0, 0], sizes = [2, 32], strides = [1, 1]} : vector<2x96xf32> to vector<2x32xf32>
    %267 = vector.extract_strided_slice %265 {offsets = [0, 32], sizes = [2, 32], strides = [1, 1]} : vector<2x96xf32> to vector<2x32xf32>
    %268 = vector.extract_strided_slice %265 {offsets = [0, 64], sizes = [2, 32], strides = [1, 1]} : vector<2x96xf32> to vector<2x32xf32>
    %269 = vector.extract_strided_slice %259 {offsets = [0, 96], sizes = [2, 32], strides = [1, 1]} : vector<2x128xf32> to vector<2x32xf32>
    %270 = math.tanh %269 : vector<2x32xf32>
    %271 = arith.mulf %267, %234 : vector<2x32xf32>
    %272 = arith.mulf %266, %270 : vector<2x32xf32>
    %273 = arith.addf %271, %272 : vector<2x32xf32>
    %274 = math.tanh %273 : vector<2x32xf32>
    %275 = arith.mulf %268, %274 : vector<2x32xf32>
    %cst_53 = arith.constant dense<0.000000e+00> : vector<2x128xf32>
    %276 = tpu.matmul %275, %1, %cst_53 {dimension_numbers = #tpu.dot_dimension_numbers<[1], [0], [0], [1], [0, 0, 1, 1], [], []>} : vector<2x32xf32>, vector<32x128xf32>, vector<2x128xf32> -> vector<2x128xf32>
    %277 = vector.broadcast %5 : vector<1x128xf32> to vector<2x128xf32>
    %278 = arith.addf %276, %277 : vector<2x128xf32>
    %cst_54 = arith.constant dense<0.000000e+00> : vector<2x128xf32>
    %279 = tpu.matmul %257, %3, %cst_54 {dimension_numbers = #tpu.dot_dimension_numbers<[1], [0], [0], [1], [0, 0, 1, 1], [], []>} : vector<2x32xf32>, vector<32x128xf32>, vector<2x128xf32> -> vector<2x128xf32>
    %280 = arith.addf %278, %279 : vector<2x128xf32>
    %281 = vector.extract_strided_slice %280 {offsets = [0, 0], sizes = [2, 96], strides = [1, 1]} : vector<2x128xf32> to vector<2x96xf32>
    %282 = arith.negf %281 : vector<2x96xf32>
    %283 = math.exp %282 : vector<2x96xf32>
    %cst_55 = arith.constant 1.000000e+00 : f32
    %284 = vector.broadcast %cst_55 : f32 to vector<2x96xf32>
    %285 = arith.addf %284, %283 : vector<2x96xf32>
    %286 = arith.divf %284, %285 : vector<2x96xf32>
    %287 = vector.extract_strided_slice %286 {offsets = [0, 0], sizes = [2, 32], strides = [1, 1]} : vector<2x96xf32> to vector<2x32xf32>
    %288 = vector.extract_strided_slice %286 {offsets = [0, 32], sizes = [2, 32], strides = [1, 1]} : vector<2x96xf32> to vector<2x32xf32>
    %289 = vector.extract_strided_slice %286 {offsets = [0, 64], sizes = [2, 32], strides = [1, 1]} : vector<2x96xf32> to vector<2x32xf32>
    %290 = vector.extract_strided_slice %280 {offsets = [0, 96], sizes = [2, 32], strides = [1, 1]} : vector<2x128xf32> to vector<2x32xf32>
    %291 = math.tanh %290 : vector<2x32xf32>
    %292 = arith.mulf %288, %255 : vector<2x32xf32>
    %293 = arith.mulf %287, %291 : vector<2x32xf32>
    %294 = arith.addf %292, %293 : vector<2x32xf32>
    %295 = math.tanh %294 : vector<2x32xf32>
    %296 = arith.mulf %289, %295 : vector<2x32xf32>
    %cst_56 = arith.constant dense<0.000000e+00> : vector<2x128xf32>
    %297 = tpu.matmul %275, %2, %cst_56 {dimension_numbers = #tpu.dot_dimension_numbers<[1], [0], [0], [1], [0, 0, 1, 1], [], []>} : vector<2x32xf32>, vector<32x128xf32>, vector<2x128xf32> -> vector<2x128xf32>
    %298 = arith.addf %19, %297 : vector<2x128xf32>
    %299 = vector.extract_strided_slice %298 {offsets = [0, 0], sizes = [2, 96], strides = [1, 1]} : vector<2x128xf32> to vector<2x96xf32>
    %300 = arith.negf %299 : vector<2x96xf32>
    %301 = math.exp %300 : vector<2x96xf32>
    %cst_57 = arith.constant 1.000000e+00 : f32
    %302 = vector.broadcast %cst_57 : f32 to vector<2x96xf32>
    %303 = arith.addf %302, %301 : vector<2x96xf32>
    %304 = arith.divf %302, %303 : vector<2x96xf32>
    %305 = vector.extract_strided_slice %304 {offsets = [0, 0], sizes = [2, 32], strides = [1, 1]} : vector<2x96xf32> to vector<2x32xf32>
    %306 = vector.extract_strided_slice %304 {offsets = [0, 32], sizes = [2, 32], strides = [1, 1]} : vector<2x96xf32> to vector<2x32xf32>
    %307 = vector.extract_strided_slice %304 {offsets = [0, 64], sizes = [2, 32], strides = [1, 1]} : vector<2x96xf32> to vector<2x32xf32>
    %308 = vector.extract_strided_slice %298 {offsets = [0, 96], sizes = [2, 32], strides = [1, 1]} : vector<2x128xf32> to vector<2x32xf32>
    %309 = math.tanh %308 : vector<2x32xf32>
    %310 = arith.mulf %306, %273 : vector<2x32xf32>
    %311 = arith.mulf %305, %309 : vector<2x32xf32>
    %312 = arith.addf %310, %311 : vector<2x32xf32>
    %313 = math.tanh %312 : vector<2x32xf32>
    %314 = arith.mulf %307, %313 : vector<2x32xf32>
    %cst_58 = arith.constant dense<0.000000e+00> : vector<2x128xf32>
    %315 = tpu.matmul %314, %1, %cst_58 {dimension_numbers = #tpu.dot_dimension_numbers<[1], [0], [0], [1], [0, 0, 1, 1], [], []>} : vector<2x32xf32>, vector<32x128xf32>, vector<2x128xf32> -> vector<2x128xf32>
    %316 = vector.broadcast %5 : vector<1x128xf32> to vector<2x128xf32>
    %317 = arith.addf %315, %316 : vector<2x128xf32>
    %cst_59 = arith.constant dense<0.000000e+00> : vector<2x128xf32>
    %318 = tpu.matmul %296, %3, %cst_59 {dimension_numbers = #tpu.dot_dimension_numbers<[1], [0], [0], [1], [0, 0, 1, 1], [], []>} : vector<2x32xf32>, vector<32x128xf32>, vector<2x128xf32> -> vector<2x128xf32>
    %319 = arith.addf %317, %318 : vector<2x128xf32>
    %320 = vector.extract_strided_slice %319 {offsets = [0, 0], sizes = [2, 96], strides = [1, 1]} : vector<2x128xf32> to vector<2x96xf32>
    %321 = arith.negf %320 : vector<2x96xf32>
    %322 = math.exp %321 : vector<2x96xf32>
    %cst_60 = arith.constant 1.000000e+00 : f32
    %323 = vector.broadcast %cst_60 : f32 to vector<2x96xf32>
    %324 = arith.addf %323, %322 : vector<2x96xf32>
    %325 = arith.divf %323, %324 : vector<2x96xf32>
    %326 = vector.extract_strided_slice %325 {offsets = [0, 0], sizes = [2, 32], strides = [1, 1]} : vector<2x96xf32> to vector<2x32xf32>
    %327 = vector.extract_strided_slice %325 {offsets = [0, 32], sizes = [2, 32], strides = [1, 1]} : vector<2x96xf32> to vector<2x32xf32>
    %328 = vector.extract_strided_slice %325 {offsets = [0, 64], sizes = [2, 32], strides = [1, 1]} : vector<2x96xf32> to vector<2x32xf32>
    %329 = vector.extract_strided_slice %319 {offsets = [0, 96], sizes = [2, 32], strides = [1, 1]} : vector<2x128xf32> to vector<2x32xf32>
    %330 = math.tanh %329 : vector<2x32xf32>
    %331 = arith.mulf %327, %294 : vector<2x32xf32>
    %332 = arith.mulf %326, %330 : vector<2x32xf32>
    %333 = arith.addf %331, %332 : vector<2x32xf32>
    %334 = math.tanh %333 : vector<2x32xf32>
    %335 = arith.mulf %328, %334 : vector<2x32xf32>
    %336 = tpu.concatenate %62, %101, %140, %179, %218, %257, %296, %335 in 0 : vector<2x32xf32>, vector<2x32xf32>, vector<2x32xf32>, vector<2x32xf32>, vector<2x32xf32>, vector<2x32xf32>, vector<2x32xf32>, vector<2x32xf32> -> vector<16x32xf32>
    %cst_61 = arith.constant dense<0.000000e+00> : vector<16x128xf32>
    %337 = tpu.matmul %336, %6, %cst_61 {dimension_numbers = #tpu.dot_dimension_numbers<[1], [0], [0], [1], [0, 0, 1, 1], [], []>} : vector<16x32xf32>, vector<32x128xf32>, vector<16x128xf32> -> vector<16x128xf32>
    %338 = vector.broadcast %7 : vector<1x128xf32> to vector<16x128xf32>
    %339 = arith.addf %337, %338 : vector<16x128xf32>
    %c0_62 = arith.constant 0 : index
    %c0_63 = arith.constant 0 : index
    %340 = vector.load %arg10[%c0_62, %c0_63] : memref<16x128xf32, #tpu.memory_space<vmem>>, vector<16x128xf32>
    tpu.vector_store %arg10[%c0_62, %c0_63], %339 {strides = array<i32>} : memref<16x128xf32, #tpu.memory_space<vmem>>, vector<16x128xf32>,
    return
  }
  func.func @transform_0(%arg0: i32) -> (i32, i32) {
    %c0_i32 = arith.constant 0 : i32
    %c0_i32_0 = arith.constant 0 : i32
    %c0_i32_1 = arith.constant 0 : i32
    return %c0_i32, %c0_i32_0 : i32, i32
  }
  func.func @transform_1(%arg0: i32) -> (i32, i32) {
    %c0_i32 = arith.constant 0 : i32
    %c0_i32_0 = arith.constant 0 : i32
    %c0_i32_1 = arith.constant 0 : i32
    return %c0_i32, %c0_i32_0 : i32, i32
  }
  func.func @transform_2(%arg0: i32) -> (i32, i32) {
    %c0_i32 = arith.constant 0 : i32
    %c0_i32_0 = arith.constant 0 : i32
    %c0_i32_1 = arith.constant 0 : i32
    return %c0_i32, %c0_i32_0 : i32, i32
  }
  func.func @transform_3(%arg0: i32) -> (i32, i32) {
    %c0_i32 = arith.constant 0 : i32
    %c0_i32_0 = arith.constant 0 : i32
    %c0_i32_1 = arith.constant 0 : i32
    return %c0_i32, %c0_i32_0 : i32, i32
  }
  func.func @transform_4(%arg0: i32) -> (i32, i32) {
    %c0_i32 = arith.constant 0 : i32
    %c0_i32_0 = arith.constant 0 : i32
    %c0_i32_1 = arith.constant 0 : i32
    return %c0_i32, %c0_i32_0 : i32, i32
  }
  func.func @transform_5(%arg0: i32) -> (i32, i32) {
    %c0_i32 = arith.constant 0 : i32
    %c0_i32_0 = arith.constant 0 : i32
    %c0_i32_1 = arith.constant 0 : i32
    return %c0_i32, %c0_i32_0 : i32, i32
  }
  func.func @transform_6(%arg0: i32) -> (i32, i32) {
    %c0_i32 = arith.constant 0 : i32
    %c0_i32_0 = arith.constant 0 : i32
    %c0_i32_1 = arith.constant 0 : i32
    return %c0_i32, %c0_i32_0 : i32, i32
  }
  func.func @transform_7(%arg0: i32) -> (i32, i32) {
    %c0_i32 = arith.constant 0 : i32
    %c0_i32_0 = arith.constant 0 : i32
    %c0_i32_1 = arith.constant 0 : i32
    return %c0_i32, %c0_i32_0 : i32, i32
  }
  func.func @transform_8(%arg0: i32) -> (i32, i32) {
    %c0_i32 = arith.constant 0 : i32
    %c0_i32_0 = arith.constant 0 : i32
    %c0_i32_1 = arith.constant 0 : i32
    return %c0_i32, %c0_i32_0 : i32, i32
  }
  func.func @transform_9(%arg0: i32) -> (i32, i32) {
    %c0_i32 = arith.constant 0 : i32
    %c0_i32_0 = arith.constant 0 : i32
    %c0_i32_1 = arith.constant 0 : i32
    return %c0_i32, %c0_i32_0 : i32, i32
  }
}

</mosaic_0001>

<bundles_post_ra>
// kernel: decoder_forward.1
= control target key start
LH: loop header
LB: loop body
LE: loop exit
PB: predicated region body
PF: predicated region fallthrough
CT: control target
= control target key end

     0   :  { %vm59_vm0 = vcmask 195584   ;;  %v1545_v8 = vmov 0.0   ;;  %s1546_s25 = smov 32   ;;  %vm89_vm5 = vcmask 261120   ;;  %s2007_s1 = inlined_call_operand.vmem [shape: f32[24,128], index: 1, kind: input, shape index: {}]   ;;  %s2008_s2 = inlined_call_operand.vmem [shape: f32[32,128], index: 2, kind: input, shape index: {}]   ;;  %s2009_s0 = inlined_call_operand.vmem [shape: f32[16,24], index: 0, kind: input, shape index: {}]   ;;  %s2010_s3 = inlined_call_operand.vmem [shape: f32[1,128], index: 3, kind: input, shape index: {}]   ;;  %s2011_s4 = inlined_call_operand.vmem [shape: f32[32,128], index: 4, kind: input, shape index: {}]   ;;  %s2012_s5 = inlined_call_operand.vmem [shape: f32[32,128], index: 5, kind: input, shape index: {}]   ;;  %s2013_s6 = inlined_call_operand.vmem [shape: f32[1,128], index: 6, kind: input, shape index: {}]   ;;  %s2014_s7 = inlined_call_operand.vmem [shape: f32[32,128], index: 7, kind: input, shape index: {}]   ;;  %s2015_s8 = inlined_call_operand.vmem [shape: f32[1,128], index: 8, kind: input, shape index: {}]   ;;  %s2016_s9 = inlined_call_operand.vmem [shape: f32[16,128], index: 9, kind: output, shape index: {}]  }
   0x1   :  { %v34_v0 = vld [vmem:[%s2007_s1 + $0x10] sm:$0xff]  ;;  %v1604_v1 = vld [vmem:[%s2008_s2 + $0x18] sm:$0xff]  ;;  %v33_v2 = vld [vmem:[%s2007_s1 + $0x8] sm:$0xff] }
   0x2   :  { %79 = vmatpush.msra.mxu0 %v34_v0  ;;  %105 = vmatpush.msra.mxu1 %v1604_v1  ;;  %v1613_v3 = vld [vmem:[%s2008_s2 + $0x10] sm:$0xff]  ;;  %v32_v4 = vld [vmem:[%s2007_s1] sm:$0xff]  ;;  %v1621_v5 = vld [vmem:[%s2008_s2 + $0x8] sm:$0xff] }
   0x3   :  { %v54_v6 = vld [vmem:[%s2009_s0] sm:$0xff]  ;;  %v1662_v34 = vld [vmem:[%s2011_s4 + $0x18] sm:$0xff]  ;;  %v1667_v35 = vld [vmem:[%s2011_s4 + $0x10] sm:$0xff] }
   0x4   :  { %80 = vmatpush.msra.mxu0 %v33_v2  ;;  %106 = vmatpush.msra.mxu1 %v1613_v3  ;;  %v1630_v7 = vld [vmem:[%s2008_s2] sm:$0xff]  ;;  %v1674_v36 = vld [vmem:[%s2011_s4 + $0x8] sm:$0xff]  ;;  %v1699_v40 = vld [vmem:[%s2012_s5 + $0x18] sm:$0xff] }
   0x5   :  { %v1647_v9 = vld [vmem:[%s2010_s3] ss:$0 sm:$0xff]  ;;  %171 = vmatpush.msra.mxu3 %v1662_v34  ;;  %319 = vmatpush.msra.mxu2 %v1662_v34  ;;  %v1704_v41 = vld [vmem:[%s2012_s5 + $0x10] sm:$0xff]  ;;  %v1711_v42 = vld [vmem:[%s2012_s5 + $0x8] sm:$0xff] }
   0x6   :  { %81 = vmatpush.msra.mxu0 %v32_v4  ;;  %107 = vmatpush.msra.mxu1 %v1621_v5  ;;  %v1683_v37 = vld [vmem:[%s2011_s4] sm:$0xff]  ;;  %s1547_s4 = smov 64  }
   0x7   :  { %1368 = vmatmul.msk.f32.vlgmr.msra.gmra.mxu0 %vm59_vm0, %v54_v6  ;;  %172 = vmatpush.msra.mxu3 %v1667_v35  ;;  %v1718_v43 = vld [vmem:[%s2012_s5] sm:$0xff] }
   0x8   :  { %108 = vmatpush.msra.mxu1 %v1630_v7  ;;  %402 = vmatpush.msrb.mxu0 %v1604_v1  ;;  %v1743_v49 = vld [vmem:[%s2013_s6] ss:$0 sm:$0xff] }
   0x9   :  { %109 = vmatmul.f32.vlgmr.msra.gmra.mxu1 %v1545_v8  ;;  %320 = vmatpush.msra.mxu2 %v1667_v35 }
   0xa   :  { %249 = vmatpush.msrb.mxu1 %v1604_v1  ;;  %403 = vmatpush.msrb.mxu0 %v1613_v3 }
   0xb   :  { %173 = vmatpush.msra.mxu3 %v1674_v36  ;;  %321 = vmatpush.msra.mxu2 %v1674_v36 }
   0xc   :  { %250 = vmatpush.msrb.mxu1 %v1613_v3  ;;  %404 = vmatpush.msrb.mxu0 %v1621_v5 }
   0xd   :  { %174 = vmatpush.msra.mxu3 %v1683_v37  ;;  %322 = vmatpush.msra.mxu2 %v1683_v37 }
   0xe   :  { %251 = vmatpush.msrb.mxu1 %v1621_v5  ;;  %405 = vmatpush.msrb.mxu0 %v1630_v7 }
   0xf   :  { %191 = vmatpush.msrb.mxu3 %v1699_v40  ;;  %497 = vmatpush.msrb.mxu2 %v1699_v40 }
  0x10   :  { %252 = vmatpush.msrb.mxu1 %v1630_v7  ;;  %625 = vmatpush.msra.mxu0 %v1662_v34 }
  0x11   :  { %192 = vmatpush.msrb.mxu3 %v1704_v41  ;;  %498 = vmatpush.msrb.mxu2 %v1704_v41 }
  0x12   :  { %472 = vmatpush.msra.mxu1 %v1662_v34  ;;  %626 = vmatpush.msra.mxu0 %v1667_v35 }
  0x13   :  { %193 = vmatpush.msrb.mxu3 %v1711_v42  ;;  %499 = vmatpush.msrb.mxu2 %v1711_v42 }
  0x14   :  { %473 = vmatpush.msra.mxu1 %v1667_v35  ;;  %627 = vmatpush.msra.mxu0 %v1674_v36 }
  0x15   :  { %194 = vmatpush.msrb.mxu3 %v1718_v43  ;;  %500 = vmatpush.msrb.mxu2 %v1718_v43 }
  0x16   :  { %474 = vmatpush.msra.mxu1 %v1674_v36  ;;  %628 = vmatpush.msra.mxu0 %v1683_v37 }
  0x18   :  { %475 = vmatpush.msra.mxu1 %v1683_v37 }
  0x84   :  { %v83_v10 = vpop.f32.mrf.mxu0 }
  0x85   :  { %v1650_v11 = vadd.f32 %v1647_v9, %v83_v10 }
  0x86   :  { %v110_v12 = vpop.f32.mrf.mxu1 }
  0x87   :  { %v113_v13 = vadd.f32 %v110_v12, %v1650_v11 }
  0x89   :  { %1416 = vtanh.f32 %v113_v13  ;;  %v1370_v15 = vmul.f32 -1.442695, %v113_v13 }
  0x8b   :  { %1418 = vpow2.f32 %v1370_v15 }
  0x8f   :  { %v1417_v14 = vpop.eup %1416 }
  0x90   :  { %136 = vrot.lane.b32.xlu0 %v1417_v14, %s1546_s25 }
  0x91   :  { %v1419_v16 = vpop.eup %1418 }
  0x92   :  { %v117_v17 = vadd.f32 1.0, %v1419_v16 }
  0x94   :  { %1420 = vrcp.f32 %v117_v17  ;;  %v129_v23 = vand.u32 2147483648, %v117_v17  ;;  %vm123_vm2 = vweird.f32 %v117_v17  ;;  %v127_v24 = vand.u32 2147483647, %v117_v17 }
  0x96   :  { %v130_v26 = vor.u32 1.1754944e-38, %v129_v23  ;;  %vm128_vm4 = vcmp.eq.f32.partialorder %v127_v24, 8.507059e+37 }
  0x9a   :  { %v1421_v18 = vpop.eup %1420 }
  0x9b   :  { %v119_v19 = vmul.f32 %v1421_v18, %v117_v17  ;;  %vm124_vm1 = vweird.f32 %v1421_v18 }
  0x9c   :  { %vm125_vm3 = vmor %vm123_vm2, %vm124_vm1 }
  0x9d   :  { %v120_v20 = vsub.f32 1.0, %v119_v19 }
  0x9f   :  { %v121_v21 = vmul.f32 %v1421_v18, %v120_v20 }
  0xa1   :  { %v122_v22 = vadd.f32 %v1421_v18, %v121_v21 }
  0xa3   :  { %v126_v25 = vsel %vm125_vm3, %v1421_v18, %v122_v22 }
  0xa4   :  { %v131_v28 = vsel %vm128_vm4, %v130_v26, %v126_v25 }
  0xa5   :  { %v134_v30 = vmul.f32 0.0, %v131_v28 }
 0x102   :  { %v137_v27 = vpop.permute.xlu0 %136 }
 0x103   :  { %v139_v29 = vmul.f32 %v137_v27, %v131_v28 }
 0x105   :  { %141 = vrot.lane.b32.xlu0 %v139_v29, %s1546_s25 }
 0x177   :  { %v142_v31 = vpop.permute.xlu0 %141 }
 0x178   :  { %v1655_v32 = vadd.f32 %v142_v31, %v134_v30 }
 0x17a   :  { %1422 = vtanh.f32 %v1655_v32  ;;  %v282_v27 = vrot.slane %v1655_v32, 6 }
 0x180   :  { %v1423_v33 = vpop.eup %1422 }
 0x181   :  { %147 = vrot.lane.b32.xlu1 %v1423_v33, %s1546_s25 }
 0x1f3   :  { %v148_v38 = vpop.permute.xlu1 %147 }
 0x1f4   :  { %v150_v39 = vmul.f32 %v148_v38, %v131_v28 }
 0x1f6   :  { %155 = vrot.lane.b32.xlu1 %v150_v39, %s1547_s4 }
 0x268   :  { %v156_v44 = vpop.permute.xlu1 %155 }
 0x269   :  { %1371 = vmatmul.msk.f32.vlgmr.msra.gmra.mxu3 %vm89_vm5, %v156_v44  ;;  %1373 = vmatmul.msk.f32.vlgmr.msrb.gmra.mxu1 %vm89_vm5, %v156_v44 }
 0x26a   :  { %344 = vmatpush.msra.mxu3 %v1699_v40  ;;  %650 = vmatpush.msrb.mxu1 %v1699_v40 }
 0x26c   :  { %345 = vmatpush.msra.mxu3 %v1704_v41  ;;  %651 = vmatpush.msrb.mxu1 %v1704_v41 }
 0x26e   :  { %346 = vmatpush.msra.mxu3 %v1711_v42  ;;  %652 = vmatpush.msrb.mxu1 %v1711_v42 }
 0x270   :  { %347 = vmatpush.msra.mxu3 %v1718_v43  ;;  %653 = vmatpush.msrb.mxu1 %v1718_v43 }
 0x271   :  { %195 = vmatmul.f32.vlgmr.msrb.gmra.mxu3 %v1545_v8 }
 0x272   :  { %555 = vmatpush.msrb.mxu3 %v1604_v1 }
 0x274   :  { %556 = vmatpush.msrb.mxu3 %v1613_v3 }
 0x276   :  { %557 = vmatpush.msrb.mxu3 %v1621_v5 }
 0x278   :  { %558 = vmatpush.msrb.mxu3 %v1630_v7 }
 0x2e6   :  { %v254_v45 = vpop.f32.mrf.mxu1 }
 0x2e7   :  { %v258_v46 = vrot.slane %v254_v45, 6 }
 0x2e9   :  { %v260_v47 = vadd.f32 %v258_v46, %v1650_v11 }
 0x2eb   :  { %1424 = vtanh.f32 %v260_v47  ;;  %v1374_v55 = vmul.f32 -1.442695, %v260_v47  ;;  %v55_v47 = vld [vmem:[%s2009_s0 + $0x8] sm:$0xff] }
 0x2ec   :  { %v176_v48 = vpop.f32.mrf.mxu3  ;;  %1369 = vmatmul.msk.f32.gmra.mxu0 %vm59_vm0, %v55_v47 }
 0x2ed   :  { %v177_v51 = vadd.f32 %v1743_v49, %v176_v48 }
 0x2f1   :  { %v1425_v50 = vpop.eup %1424 }
 0x2f2   :  { %286 = vrot.lane.b32.xlu2 %v1425_v50, %s1546_s25 }
 0x2f4   :  { %v196_v52 = vpop.f32.mrf.mxu3 }
 0x2f5   :  { %v199_v53 = vadd.f32 %v196_v52, %v177_v51 }
 0x2f7   :  { %1426 = vtanh.f32 %v199_v53  ;;  %v1372_v57 = vmul.f32 -1.442695, %v199_v53 }
 0x2f8   :  { %1428 = vpow2.f32 %v1374_v55 }
 0x2f9   :  { %1430 = vpow2.f32 %v1372_v57 }
 0x2fd   :  { %v1427_v54 = vpop.eup %1426 }
 0x2fe   :  { %222 = vrot.lane.b32.xlu2 %v1427_v54, %s1546_s25  ;;  %v1429_v56 = vpop.eup %1428 }
 0x2ff   :  { %v264_v58 = vadd.f32 1.0, %v1429_v56  ;;  %v1431_v59 = vpop.eup %1430 }
 0x300   :  { %v203_v61 = vadd.f32 1.0, %v1431_v59 }
 0x301   :  { %1432 = vrcp.f32 %v264_v58  ;;  %v276_v8 = vand.u32 2147483648, %v264_v58  ;;  %vm270_vm7 = vweird.f32 %v264_v58  ;;  %v274_v10 = vand.u32 2147483647, %v264_v58 }
 0x302   :  { %1434 = vrcp.f32 %v203_v61  ;;  %v215_v20 = vand.u32 2147483648, %v203_v61  ;;  %vm209_vm11 = vweird.f32 %v203_v61  ;;  %v213_v21 = vand.u32 2147483647, %v203_v61 }
 0x303   :  { %v277_v14 = vor.u32 1.1754944e-38, %v276_v8  ;;  %vm275_vm9 = vcmp.eq.f32.partialorder %v274_v10, 8.507059e+37 }
 0x304   :  { %v216_v23 = vor.u32 1.1754944e-38, %v215_v20  ;;  %vm214_vm13 = vcmp.eq.f32.partialorder %v213_v21, 8.507059e+37 }
 0x307   :  { %v1433_v60 = vpop.eup %1432 }
 0x308   :  { %v266_v62 = vmul.f32 %v1433_v60, %v264_v58  ;;  %v1435_v2 = vpop.eup %1434  ;;  %vm271_vm6 = vweird.f32 %v1433_v60 }
 0x309   :  { %v205_v6 = vmul.f32 %v1435_v2, %v203_v61  ;;  %vm272_vm8 = vmor %vm270_vm7, %vm271_vm6  ;;  %vm210_vm10 = vweird.f32 %v1435_v2 }
 0x30a   :  { %v267_v63 = vsub.f32 1.0, %v266_v62  ;;  %vm211_vm12 = vmor %vm209_vm11, %vm210_vm10 }
 0x30b   :  { %v206_v13 = vsub.f32 1.0, %v205_v6 }
 0x30c   :  { %v268_v0 = vmul.f32 %v1433_v60, %v267_v63 }
 0x30d   :  { %v207_v18 = vmul.f32 %v1435_v2, %v206_v13 }
 0x30e   :  { %v269_v4 = vadd.f32 %v1433_v60, %v268_v0 }
 0x30f   :  { %v208_v19 = vadd.f32 %v1435_v2, %v207_v18 }
 0x310   :  { %v273_v12 = vsel %vm272_vm8, %v1433_v60, %v269_v4 }
 0x311   :  { %v278_v16 = vsel %vm275_vm9, %v277_v14, %v273_v12  ;;  %v212_v22 = vsel %vm211_vm12, %v1435_v2, %v208_v19 }
 0x312   :  { %v217_v25 = vsel %vm214_vm13, %v216_v23, %v212_v22  ;;  %v284_v28 = vmul.f32 %v282_v27, %v278_v16 }
 0x313   :  { %v220_v33 = vmul.f32 0.0, %v217_v25 }
 0x34c   :  { %v287_v15 = vpop.permute.xlu2 %286 }
 0x34d   :  { %v289_v17 = vmul.f32 %v287_v15, %v278_v16 }
 0x34f   :  { %291 = vrot.lane.b32.xlu0 %v289_v17, %s1546_s25 }
 0x358   :  { %v223_v24 = vpop.permute.xlu2 %222 }
 0x359   :  { %v225_v26 = vmul.f32 %v223_v24, %v217_v25 }
 0x35b   :  { %227 = vrot.lane.b32.xlu1 %v225_v26, %s1546_s25 }
 0x369   :  { %v1783_v53 = vpop.f32.mrf.mxu0 }
 0x3c1   :  { %v292_v29 = vpop.permute.xlu0 %291 }
 0x3c2   :  { %v1751_v30 = vadd.f32 %v292_v29, %v284_v28 }
 0x3c4   :  { %1436 = vtanh.f32 %v1751_v30 }
 0x3ca   :  { %v1437_v31 = vpop.eup %1436 }
 0x3cb   :  { %297 = vrot.lane.b32.xlu2 %v1437_v31, %s1546_s25 }
 0x3cd   :  { %v228_v38 = vpop.permute.xlu1 %227 }
 0x3ce   :  { %v1755_v39 = vadd.f32 %v228_v38, %v220_v33 }
 0x3d0   :  { %1438 = vtanh.f32 %v1755_v39 }
 0x3d6   :  { %v1439_v44 = vpop.eup %1438 }
 0x3d7   :  { %233 = vrot.lane.b32.xlu0 %v1439_v44, %s1546_s25 }
 0x425   :  { %v298_v45 = vpop.permute.xlu2 %297 }
 0x426   :  { %v300_v32 = vmul.f32 %v298_v45, %v278_v16 }
 0x428   :  { %v302_v46 = vrot.slane %v300_v32, 2  ;;  %v435_v32 = vrot.slane %v1751_v30, 6 }
 0x42a   :  { %303 = vrot.lane.b32.xlu1 %v302_v46, %s1547_s4 }
 0x449   :  { %v234_v48 = vpop.permute.xlu0 %233 }
 0x44a   :  { %v1764_v50 = vmul.f32 %v234_v48, %v217_v25 }
 0x44c   :  { %328 = vrot.lane.b32.xlu2 %v1764_v50, %s1547_s4 }
 0x49c   :  { %v304_v51 = vpop.permute.xlu1 %303 }
 0x49d   :  { %1375 = vmatmul.msk.f32.vlgmr.msra.gmra.mxu2 %vm89_vm5, %v304_v51  ;;  %1378 = vmatmul.msk.f32.vlgmr.msrb.gmra.mxu0 %vm89_vm5, %v304_v51 }
 0x49e   :  { %708 = vmatpush.msra.mxu2 %v1604_v1  ;;  %799 = vmatpush.msrb.mxu0 %v1699_v40 }
 0x4a0   :  { %709 = vmatpush.msra.mxu2 %v1613_v3  ;;  %800 = vmatpush.msrb.mxu0 %v1704_v41 }
 0x4a2   :  { %710 = vmatpush.msra.mxu2 %v1621_v5  ;;  %801 = vmatpush.msrb.mxu0 %v1711_v42 }
 0x4a4   :  { %711 = vmatpush.msra.mxu2 %v1630_v7  ;;  %802 = vmatpush.msrb.mxu0 %v1718_v43 }
 0x4a6   :  { %v329_v52 = vpop.permute.xlu2 %328 }
 0x4a7   :  { %1376 = vmatmul.msk.f32.vlgmr.msra.gmra.mxu3 %vm89_vm5, %v329_v52 }
 0x4a8   :  { %774 = vmatpush.msra.mxu3 %v1662_v34 }
 0x4aa   :  { %775 = vmatpush.msra.mxu3 %v1667_v35 }
 0x4ac   :  { %776 = vmatpush.msra.mxu3 %v1674_v36 }
 0x4ae   :  { %777 = vmatpush.msra.mxu3 %v1683_v37 }
 0x51a   :  { %v407_v54 = vpop.f32.mrf.mxu0 }
 0x51b   :  { %v411_v55 = vrot.slane %v407_v54, 4 }
 0x51d   :  { %v413_v56 = vadd.f32 %v411_v55, %v1650_v11 }
 0x51f   :  { %1440 = vtanh.f32 %v413_v56  ;;  %v1379_v63 = vmul.f32 -1.442695, %v413_v56 }
 0x520   :  { %v324_v58 = vpop.f32.mrf.mxu2 }
 0x521   :  { %v325_v59 = vadd.f32 %v1743_v49, %v324_v58 }
 0x525   :  { %v1441_v57 = vpop.eup %1440 }
 0x526   :  { %439 = vrot.lane.b32.xlu0 %v1441_v57, %s1546_s25 }
 0x52a   :  { %v349_v60 = vpop.f32.mrf.mxu3 }
 0x52b   :  { %v352_v61 = vadd.f32 %v349_v60, %v325_v59 }
 0x52d   :  { %1442 = vtanh.f32 %v352_v61  ;;  %v1377_v4 = vmul.f32 -1.442695, %v352_v61 }
 0x52e   :  { %1444 = vpow2.f32 %v1379_v63 }
 0x533   :  { %v1443_v62 = vpop.eup %1442 }
 0x534   :  { %375 = vrot.lane.b32.xlu1 %v1443_v62, %s1546_s25  ;;  %v1445_v0 = vpop.eup %1444 }
 0x535   :  { %v417_v2 = vadd.f32 1.0, %v1445_v0 }
 0x537   :  { %1446 = vrcp.f32 %v417_v2  ;;  %v429_v17 = vand.u32 2147483648, %v417_v2  ;;  %vm423_vm15 = vweird.f32 %v417_v2  ;;  %v427_v18 = vand.u32 2147483647, %v417_v2 }
 0x538   :  { %1448 = vpow2.f32 %v1377_v4 }
 0x539   :  { %v430_v21 = vor.u32 1.1754944e-38, %v429_v17  ;;  %vm428_vm1 = vcmp.eq.f32.partialorder %v427_v18, 8.507059e+37 }
 0x53d   :  { %v1447_v6 = vpop.eup %1446 }
 0x53e   :  { %v1449_v8 = vpop.eup %1448  ;;  %v419_v10 = vmul.f32 %v1447_v6, %v417_v2  ;;  %vm424_vm14 = vweird.f32 %v1447_v6 }
 0x53f   :  { %v356_v12 = vadd.f32 1.0, %v1449_v8  ;;  %vm425_vm0 = vmor %vm423_vm15, %vm424_vm14  ;;  %vm1317_vm15 = vcmask 1041408  }
 0x540   :  { %v420_v13 = vsub.f32 1.0, %v419_v10 }
 0x541   :  { %1450 = vrcp.f32 %v356_v12  ;;  %v368_v28 = vand.u32 2147483648, %v356_v12  ;;  %vm362_vm3 = vweird.f32 %v356_v12  ;;  %v366_v29 = vand.u32 2147483647, %v356_v12 }
 0x542   :  { %v421_v14 = vmul.f32 %v1447_v6, %v420_v13 }
 0x543   :  { %v369_v33 = vor.u32 1.1754944e-38, %v368_v28  ;;  %vm367_vm6 = vcmp.eq.f32.partialorder %v366_v29, 8.507059e+37 }
 0x544   :  { %v422_v16 = vadd.f32 %v1447_v6, %v421_v14 }
 0x546   :  { %v426_v20 = vsel %vm425_vm0, %v1447_v6, %v422_v16  ;;  %vm1319_vm0 = vcmask 1043456  }
 0x547   :  { %v1451_v15 = vpop.eup %1450  ;;  %v431_v23 = vsel %vm428_vm1, %v430_v21, %v426_v20 }
 0x548   :  { %v358_v19 = vmul.f32 %v1451_v15, %v356_v12  ;;  %vm363_vm2 = vweird.f32 %v1451_v15  ;;  %v437_v46 = vmul.f32 %v435_v32, %v431_v23 }
 0x549   :  { %vm364_vm4 = vmor %vm362_vm3, %vm363_vm2 }
 0x54a   :  { %v359_v22 = vsub.f32 1.0, %v358_v19 }
 0x54c   :  { %v360_v26 = vmul.f32 %v1451_v15, %v359_v22 }
 0x54e   :  { %v361_v27 = vadd.f32 %v1451_v15, %v360_v26 }
 0x550   :  { %v365_v31 = vsel %vm364_vm4, %v1451_v15, %v361_v27 }
 0x551   :  { %v370_v44 = vsel %vm367_vm6, %v369_v33, %v365_v31 }
 0x552   :  { %v373_v52 = vmul.f32 %v370_v44, %v1755_v39 }
 0x598   :  { %v440_v24 = vpop.permute.xlu0 %439 }
 0x599   :  { %v442_v25 = vmul.f32 %v440_v24, %v431_v23 }
 0x59b   :  { %444 = vrot.lane.b32.xlu2 %v442_v25, %s1546_s25 }
 0x5a6   :  { %v376_v38 = vpop.permute.xlu1 %375 }
 0x5a7   :  { %v378_v45 = vmul.f32 %v376_v38, %v370_v44 }
 0x5a9   :  { %380 = vrot.lane.b32.xlu0 %v378_v45, %s1546_s25 }
 0x5f5   :  { %v445_v47 = vpop.permute.xlu2 %444 }
 0x5f6   :  { %v1792_v48 = vadd.f32 %v445_v47, %v437_v46 }
 0x5f8   :  { %1452 = vtanh.f32 %v1792_v48 }
 0x5fe   :  { %v1453_v51 = vpop.eup %1452 }
 0x5ff   :  { %450 = vrot.lane.b32.xlu1 %v1453_v51, %s1546_s25 }
 0x61b   :  { %v381_v54 = vpop.permute.xlu0 %380 }
 0x61c   :  { %v1797_v55 = vadd.f32 %v381_v54, %v373_v52 }
 0x61e   :  { %1454 = vtanh.f32 %v1797_v55 }
 0x624   :  { %v1455_v56 = vpop.eup %1454 }
 0x625   :  { %386 = vrot.lane.b32.xlu2 %v1455_v56, %s1546_s25 }
 0x671   :  { %v451_v30 = vpop.permute.xlu1 %450 }
 0x672   :  { %v453_v57 = vmul.f32 %v451_v30, %v431_v23  ;;  %v588_v30 = vrot.slane %v1792_v48, 6 }
 0x674   :  { %v455_v58 = vrot.slane %v453_v57, 4 }
 0x676   :  { %456 = vrot.lane.b32.xlu0 %v455_v58, %s1547_s4 }
 0x67f   :  { %v387_v59 = vpop.permute.xlu2 %386 }
 0x680   :  { %v1802_v60 = vmul.f32 %v387_v59, %v370_v44 }
 0x682   :  { %481 = vrot.lane.b32.xlu1 %v1802_v60, %s1547_s4 }
 0x6e8   :  { %v457_v39 = vpop.permute.xlu0 %456 }
 0x6e9   :  { %1380 = vmatmul.msk.f32.vlgmr.msra.gmra.mxu1 %vm89_vm5, %v457_v39  ;;  %1383 = vmatmul.msk.f32.vlgmr.msrb.gmra.mxu3 %vm89_vm5, %v457_v39 }
 0x6ea   :  { %857 = vmatpush.msra.mxu1 %v1604_v1  ;;  %952 = vmatpush.msrb.mxu3 %v1699_v40 }
 0x6ec   :  { %858 = vmatpush.msra.mxu1 %v1613_v3  ;;  %953 = vmatpush.msrb.mxu3 %v1704_v41 }
 0x6ee   :  { %859 = vmatpush.msra.mxu1 %v1621_v5  ;;  %954 = vmatpush.msrb.mxu3 %v1711_v42 }
 0x6f0   :  { %860 = vmatpush.msra.mxu1 %v1630_v7  ;;  %955 = vmatpush.msrb.mxu3 %v1718_v43 }
 0x6f4   :  { %v482_v61 = vpop.permute.xlu1 %481 }
 0x6f5   :  { %1381 = vmatmul.msk.f32.vlgmr.msrb.gmra.mxu2 %vm89_vm5, %v482_v61 }
 0x6f6   :  { %927 = vmatpush.msrb.mxu2 %v1662_v34 }
 0x6f8   :  { %928 = vmatpush.msrb.mxu2 %v1667_v35 }
 0x6fa   :  { %929 = vmatpush.msrb.mxu2 %v1674_v36 }
 0x6fc   :  { %930 = vmatpush.msrb.mxu2 %v1683_v37 }
 0x766   :  { %v477_v2 = vpop.f32.mrf.mxu1 }
 0x767   :  { %v478_v6 = vadd.f32 %v1743_v49, %v477_v2 }
 0x76c   :  { %v560_v62 = vpop.f32.mrf.mxu3 }
 0x76d   :  { %v564_v63 = vrot.slane %v560_v62, 2 }
 0x76f   :  { %v566_v0 = vadd.f32 %v564_v63, %v1650_v11 }
 0x771   :  { %1456 = vtanh.f32 %v566_v0  ;;  %v1384_v13 = vmul.f32 -1.442695, %v566_v0 }
 0x777   :  { %v1457_v4 = vpop.eup %1456 }
 0x778   :  { %v502_v8 = vpop.f32.mrf.mxu2  ;;  %592 = vrot.lane.b32.xlu2 %v1457_v4, %s1546_s25 }
 0x779   :  { %v505_v10 = vadd.f32 %v502_v8, %v478_v6  ;;  %v1304_v6 = vrot.slane %v1802_v60, 6  ;;  %v1862_v60 = vadd.f32 %v1647_v9, %v1783_v53 }
 0x77b   :  { %1458 = vtanh.f32 %v505_v10  ;;  %v1382_v18 = vmul.f32 -1.442695, %v505_v10 }
 0x77c   :  { %1460 = vpow2.f32 %v1384_v13 }
 0x781   :  { %v1459_v12 = vpop.eup %1458 }
 0x782   :  { %528 = vrot.lane.b32.xlu0 %v1459_v12, %s1546_s25  ;;  %v1461_v14 = vpop.eup %1460  ;;  %v1318_v12 = vsel %vm1317_vm15, %v1764_v50, %v1304_v6 }
 0x783   :  { %v570_v15 = vadd.f32 1.0, %v1461_v14 }
 0x785   :  { %1462 = vrcp.f32 %v570_v15  ;;  %v582_v21 = vand.u32 2147483648, %v570_v15  ;;  %vm576_vm8 = vweird.f32 %v570_v15  ;;  %v580_v22 = vand.u32 2147483647, %v570_v15 }
 0x786   :  { %1464 = vpow2.f32 %v1382_v18 }
 0x787   :  { %v583_v24 = vor.u32 1.1754944e-38, %v582_v21  ;;  %vm581_vm10 = vcmp.eq.f32.partialorder %v580_v22, 8.507059e+37 }
 0x78b   :  { %v1463_v16 = vpop.eup %1462 }
 0x78c   :  { %v572_v11 = vmul.f32 %v1463_v16, %v570_v15  ;;  %vm577_vm7 = vweird.f32 %v1463_v16  ;;  %v1465_v25 = vpop.eup %1464 }
 0x78d   :  { %vm578_vm9 = vmor %vm576_vm8, %vm577_vm7  ;;  %v509_v29 = vadd.f32 1.0, %v1465_v25 }
 0x78e   :  { %v573_v17 = vsub.f32 1.0, %v572_v11 }
 0x78f   :  { %1466 = vrcp.f32 %v509_v29  ;;  %v521_v32 = vand.u32 2147483648, %v509_v29  ;;  %vm515_vm12 = vweird.f32 %v509_v29  ;;  %v519_v46 = vand.u32 2147483647, %v509_v29 }
 0x790   :  { %v574_v19 = vmul.f32 %v1463_v16, %v573_v17 }
 0x791   :  { %v522_v51 = vor.u32 1.1754944e-38, %v521_v32  ;;  %vm520_vm14 = vcmp.eq.f32.partialorder %v519_v46, 8.507059e+37 }
 0x792   :  { %v575_v20 = vadd.f32 %v1463_v16, %v574_v19 }
 0x794   :  { %v579_v23 = vsel %vm578_vm9, %v1463_v16, %v575_v20 }
 0x795   :  { %v584_v27 = vsel %vm581_vm10, %v583_v24, %v579_v23  ;;  %v1467_v31 = vpop.eup %1466  ;;  %vm1321_vm10 = vcmask 1045504  }
 0x796   :  { %v511_v33 = vmul.f32 %v1467_v31, %v509_v29  ;;  %vm516_vm11 = vweird.f32 %v1467_v31  ;;  %v590_v57 = vmul.f32 %v588_v30, %v584_v27 }
 0x797   :  { %vm517_vm13 = vmor %vm515_vm12, %vm516_vm11 }
 0x798   :  { %v512_v38 = vsub.f32 1.0, %v511_v33 }
 0x79a   :  { %v513_v44 = vmul.f32 %v1467_v31, %v512_v38 }
 0x79c   :  { %v514_v45 = vadd.f32 %v1467_v31, %v513_v44 }
 0x79e   :  { %v518_v47 = vsel %vm517_vm13, %v1467_v31, %v514_v45 }
 0x79f   :  { %v523_v54 = vsel %vm520_vm14, %v522_v51, %v518_v47 }
 0x7a0   :  { %v526_v61 = vmul.f32 %v523_v54, %v1797_v55 }
 0x7d2   :  { %v593_v26 = vpop.permute.xlu2 %592 }
 0x7d3   :  { %v595_v28 = vmul.f32 %v593_v26, %v584_v27 }
 0x7d5   :  { %597 = vrot.lane.b32.xlu1 %v595_v28, %s1546_s25 }
 0x7f4   :  { %v529_v52 = vpop.permute.xlu0 %528 }
 0x7f5   :  { %v531_v56 = vmul.f32 %v529_v52, %v523_v54 }
 0x7f7   :  { %533 = vrot.lane.b32.xlu2 %v531_v56, %s1546_s25 }
 0x847   :  { %v598_v58 = vpop.permute.xlu1 %597 }
 0x848   :  { %v1828_v59 = vadd.f32 %v598_v58, %v590_v57 }
 0x84a   :  { %1468 = vtanh.f32 %v1828_v59 }
 0x850   :  { %v1469_v39 = vpop.eup %1468 }
 0x851   :  { %603 = vrot.lane.b32.xlu0 %v1469_v39, %s1546_s25  ;;  %v534_v62 = vpop.permute.xlu2 %533 }
 0x852   :  { %v1833_v63 = vadd.f32 %v534_v62, %v526_v61 }
 0x854   :  { %1470 = vtanh.f32 %v1833_v63 }
 0x85a   :  { %v1471_v0 = vpop.eup %1470 }
 0x85b   :  { %539 = vrot.lane.b32.xlu1 %v1471_v0, %s1546_s25 }
 0x8c3   :  { %v604_v48 = vpop.permute.xlu0 %603 }
 0x8c4   :  { %v606_v2 = vmul.f32 %v604_v48, %v584_v27 }
 0x8c6   :  { %v608_v4 = vrot.slane %v606_v2, 6  ;;  %v738_v2 = vrot.slane %v1828_v59, 6 }
 0x8c8   :  { %609 = vrot.lane.b32.xlu2 %v608_v4, %s1547_s4 }
 0x8cd   :  { %v540_v8 = vpop.permute.xlu1 %539 }
 0x8ce   :  { %v542_v10 = vmul.f32 %v540_v8, %v523_v54 }
 0x8d0   :  { %v1306_v55 = vrot.slane %v542_v10, 4  ;;  %634 = vrot.lane.b32.xlu0 %v542_v10, %s1547_s4 }
 0x8d2   :  { %v1843_v13 = vsel %vm1319_vm0, %v1318_v12, %v1306_v55 }
 0x922   :  { %v610_v14 = vpop.permute.xlu2 %609 }
 0x923   :  { %1385 = vmatmul.msk.f32.vlgmr.msra.gmra.mxu0 %vm89_vm5, %v610_v14  ;;  %1388 = vmatmul.msk.f32.vlgmr.msra.gmra.mxu2 %vm89_vm5, %v610_v14 }
 0x924   :  { %1010 = vmatpush.msra.mxu0 %v1604_v1  ;;  %1105 = vmatpush.msra.mxu2 %v1699_v40 }
 0x926   :  { %1011 = vmatpush.msra.mxu0 %v1613_v3  ;;  %1106 = vmatpush.msra.mxu2 %v1704_v41 }
 0x928   :  { %1012 = vmatpush.msra.mxu0 %v1621_v5  ;;  %1107 = vmatpush.msra.mxu2 %v1711_v42 }
 0x92a   :  { %1013 = vmatpush.msra.mxu0 %v1630_v7  ;;  %1108 = vmatpush.msra.mxu2 %v1718_v43 }
 0x942   :  { %v635_v50 = vpop.permute.xlu0 %634 }
 0x943   :  { %1386 = vmatmul.msk.f32.vlgmr.msrb.gmra.mxu1 %vm89_vm5, %v635_v50 }
 0x944   :  { %1080 = vmatpush.msrb.mxu1 %v1662_v34 }
 0x946   :  { %1081 = vmatpush.msrb.mxu1 %v1667_v35 }
 0x948   :  { %1082 = vmatpush.msrb.mxu1 %v1674_v36 }
 0x94a   :  { %1083 = vmatpush.msrb.mxu1 %v1683_v37 }
 0x9a0   :  { %v630_v17 = vpop.f32.mrf.mxu0 }
 0x9a1   :  { %v631_v18 = vadd.f32 %v1743_v49, %v630_v17 }
 0x9a6   :  { %v713_v15 = vpop.f32.mrf.mxu2 }
 0x9a7   :  { %v716_v16 = vadd.f32 %v713_v15, %v1862_v60 }
 0x9a9   :  { %1472 = vtanh.f32 %v716_v16  ;;  %v1389_v22 = vmul.f32 -1.442695, %v716_v16 }
 0x9af   :  { %v1473_v11 = vpop.eup %1472 }
 0x9b0   :  { %742 = vrot.lane.b32.xlu1 %v1473_v11, %s1546_s25 }
 0x9c0   :  { %v655_v19 = vpop.f32.mrf.mxu1 }
 0x9c1   :  { %v658_v20 = vadd.f32 %v655_v19, %v631_v18 }
 0x9c3   :  { %1474 = vtanh.f32 %v658_v20  ;;  %v1387_v23 = vmul.f32 -1.442695, %v658_v20 }
 0x9c4   :  { %1476 = vpow2.f32 %v1389_v22 }
 0x9c5   :  { %1478 = vpow2.f32 %v1387_v23 }
 0x9c9   :  { %v1475_v21 = vpop.eup %1474 }
 0x9ca   :  { %681 = vrot.lane.b32.xlu2 %v1475_v21, %s1546_s25  ;;  %v1477_v9 = vpop.eup %1476 }
 0x9cb   :  { %v1479_v53 = vpop.eup %1478  ;;  %v720_v24 = vadd.f32 1.0, %v1477_v9 }
 0x9cc   :  { %v662_v25 = vadd.f32 1.0, %v1479_v53 }
 0x9cd   :  { %1480 = vrcp.f32 %v720_v24  ;;  %v732_v32 = vand.u32 2147483648, %v720_v24  ;;  %vm726_vm2 = vweird.f32 %v720_v24  ;;  %v730_v46 = vand.u32 2147483647, %v720_v24 }
 0x9ce   :  { %1482 = vrcp.f32 %v662_v25  ;;  %v674_v51 = vand.u32 2147483648, %v662_v25  ;;  %vm668_vm6 = vweird.f32 %v662_v25  ;;  %v672_v54 = vand.u32 2147483647, %v662_v25 }
 0x9cf   :  { %v733_v56 = vor.u32 1.1754944e-38, %v732_v32  ;;  %vm731_vm8 = vcmp.eq.f32.partialorder %v730_v46, 8.507059e+37 }
 0x9d0   :  { %v675_v39 = vor.u32 1.1754944e-38, %v674_v51  ;;  %vm673_vm9 = vcmp.eq.f32.partialorder %v672_v54, 8.507059e+37 }
 0x9d3   :  { %v1481_v26 = vpop.eup %1480 }
 0x9d4   :  { %v1483_v27 = vpop.eup %1482  ;;  %v722_v28 = vmul.f32 %v1481_v26, %v720_v24  ;;  %vm727_vm1 = vweird.f32 %v1481_v26 }
 0x9d5   :  { %v664_v29 = vmul.f32 %v1483_v27, %v662_v25  ;;  %vm669_vm3 = vweird.f32 %v1483_v27  ;;  %vm728_vm4 = vmor %vm726_vm2, %vm727_vm1 }
 0x9d6   :  { %v723_v31 = vsub.f32 1.0, %v722_v28  ;;  %vm670_vm7 = vmor %vm668_vm6, %vm669_vm3 }
 0x9d7   :  { %v665_v33 = vsub.f32 1.0, %v664_v29 }
 0x9d8   :  { %v724_v38 = vmul.f32 %v1481_v26, %v723_v31 }
 0x9d9   :  { %v666_v44 = vmul.f32 %v1483_v27, %v665_v33 }
 0x9da   :  { %v725_v45 = vadd.f32 %v1481_v26, %v724_v38 }
 0x9db   :  { %v667_v47 = vadd.f32 %v1483_v27, %v666_v44 }
 0x9dc   :  { %v729_v52 = vsel %vm728_vm4, %v1481_v26, %v725_v45 }
 0x9dd   :  { %v671_v30 = vsel %vm670_vm7, %v1483_v27, %v667_v47  ;;  %v734_v57 = vsel %vm731_vm8, %v733_v56, %v729_v52 }
 0x9de   :  { %v676_v0 = vsel %vm673_vm9, %v675_v39, %v671_v30  ;;  %v740_v4 = vmul.f32 %v738_v2, %v734_v57 }
 0x9df   :  { %v679_v10 = vmul.f32 %v676_v0, %v1833_v63 }
 0xa22   :  { %v743_v58 = vpop.permute.xlu1 %742 }
 0xa23   :  { %v745_v61 = vmul.f32 %v743_v58, %v734_v57 }
 0xa24   :  { %v682_v62 = vpop.permute.xlu2 %681 }
 0xa25   :  { %v684_v48 = vmul.f32 %v682_v62, %v676_v0  ;;  %747 = vrot.lane.b32.xlu0 %v745_v61, %s1546_s25 }
 0xa27   :  { %686 = vrot.lane.b32.xlu1 %v684_v48, %s1546_s25 }
 0xa97   :  { %v748_v6 = vpop.permute.xlu0 %747 }
 0xa98   :  { %v1871_v8 = vadd.f32 %v748_v6, %v740_v4 }
 0xa99   :  { %v687_v55 = vpop.permute.xlu1 %686 }
 0xa9a   :  { %1484 = vtanh.f32 %v1871_v8  ;;  %v1875_v12 = vadd.f32 %v687_v55, %v679_v10  ;;  %v890_v58 = vrot.slane %v1871_v8, 6 }
 0xa9c   :  { %1486 = vtanh.f32 %v1875_v12 }
 0xaa0   :  { %v1485_v14 = vpop.eup %1484 }
 0xaa1   :  { %753 = vrot.lane.b32.xlu2 %v1485_v14, %s1546_s25 }
 0xaa2   :  { %v1487_v50 = vpop.eup %1486 }
 0xaa3   :  { %692 = vrot.lane.b32.xlu0 %v1487_v50, %s1546_s25 }
 0xafb   :  { %v754_v59 = vpop.permute.xlu2 %753 }
 0xafc   :  { %v756_v15 = vmul.f32 %v754_v59, %v734_v57 }
 0xafe   :  { %758 = vrot.lane.b32.xlu1 %v756_v15, %s1547_s4 }
 0xb15   :  { %v693_v16 = vpop.permute.xlu0 %692 }
 0xb16   :  { %v695_v11 = vmul.f32 %v693_v16, %v676_v0 }
 0xb18   :  { %v1308_v63 = vrot.slane %v695_v11, 2  ;;  %783 = vrot.lane.b32.xlu2 %v695_v11, %s1547_s4 }
 0xb1a   :  { %v1884_v17 = vsel %vm1321_vm10, %v1843_v13, %v1308_v63 }
 0xb70   :  { %v759_v18 = vpop.permute.xlu1 %758 }
 0xb71   :  { %1390 = vmatmul.msk.f32.vlgmr.msra.gmra.mxu3 %vm89_vm5, %v759_v18  ;;  %1393 = vmatmul.msk.f32.vlgmr.msra.gmra.mxu1 %vm89_vm5, %v759_v18 }
 0xb72   :  { %v784_v19 = vpop.permute.xlu2 %783  ;;  %1163 = vmatpush.msra.mxu3 %v1604_v1  ;;  %1258 = vmatpush.msra.mxu1 %v1699_v40 }
 0xb73   :  { %1391 = vmatmul.msk.f32.vlgmr.msrb.gmra.mxu0 %vm89_vm5, %v784_v19 }
 0xb74   :  { %1164 = vmatpush.msra.mxu3 %v1613_v3  ;;  %1233 = vmatpush.msrb.mxu0 %v1662_v34 }
 0xb75   :  { %1259 = vmatpush.msra.mxu1 %v1704_v41 }
 0xb76   :  { %1165 = vmatpush.msra.mxu3 %v1621_v5  ;;  %1234 = vmatpush.msrb.mxu0 %v1667_v35 }
 0xb77   :  { %1260 = vmatpush.msra.mxu1 %v1711_v42 }
 0xb78   :  { %1166 = vmatpush.msra.mxu3 %v1630_v7  ;;  %1235 = vmatpush.msrb.mxu0 %v1674_v36 }
 0xb79   :  { %1261 = vmatpush.msra.mxu1 %v1718_v43 }
 0xb7a   :  { %1236 = vmatpush.msrb.mxu0 %v1683_v37 }
 0xbee   :  { %v862_v1 = vpop.f32.mrf.mxu1 }
 0xbef   :  { %v866_v3 = vrot.slane %v862_v1, 6 }
 0xbf0   :  { %v804_v41 = vpop.f32.mrf.mxu0 }
 0xbf1   :  { %v868_v34 = vadd.f32 %v866_v3, %v1862_v60 }
 0xbf3   :  { %1488 = vtanh.f32 %v868_v34  ;;  %v1394_v36 = vmul.f32 -1.442695, %v868_v34 }
 0xbf4   :  { %v779_v40 = vpop.f32.mrf.mxu3 }
 0xbf5   :  { %v780_v5 = vadd.f32 %v1743_v49, %v779_v40 }
 0xbf7   :  { %v807_v35 = vadd.f32 %v804_v41, %v780_v5 }
 0xbf9   :  { %v1489_v13 = vpop.eup %1488  ;;  %1490 = vtanh.f32 %v807_v35  ;;  %v1392_v37 = vmul.f32 -1.442695, %v807_v35 }
 0xbfa   :  { %894 = vrot.lane.b32.xlu0 %v1489_v13, %s1546_s25  ;;  %1492 = vpow2.f32 %v1394_v36 }
 0xbfb   :  { %1494 = vpow2.f32 %v1392_v37 }
 0xbff   :  { %v1491_v7 = vpop.eup %1490 }
 0xc00   :  { %830 = vrot.lane.b32.xlu1 %v1491_v7, %s1546_s25  ;;  %v1493_v42 = vpop.eup %1492 }
 0xc01   :  { %v872_v43 = vadd.f32 1.0, %v1493_v42  ;;  %v1495_v20 = vpop.eup %1494 }
 0xc02   :  { %v811_v21 = vadd.f32 1.0, %v1495_v20 }
 0xc03   :  { %1496 = vrcp.f32 %v872_v43  ;;  %v884_v28 = vand.u32 2147483648, %v872_v43  ;;  %vm878_vm12 = vweird.f32 %v872_v43  ;;  %v882_v29 = vand.u32 2147483647, %v872_v43 }
 0xc04   :  { %1498 = vrcp.f32 %v811_v21  ;;  %v823_v46 = vand.u32 2147483648, %v811_v21  ;;  %vm817_vm2 = vweird.f32 %v811_v21  ;;  %v821_v51 = vand.u32 2147483647, %v811_v21 }
 0xc05   :  { %v885_v38 = vor.u32 1.1754944e-38, %v884_v28  ;;  %vm883_vm14 = vcmp.eq.f32.partialorder %v882_v29, 8.507059e+37 }
 0xc06   :  { %v824_v54 = vor.u32 1.1754944e-38, %v823_v46  ;;  %vm822_vm4 = vcmp.eq.f32.partialorder %v821_v51, 8.507059e+37 }
 0xc09   :  { %v1497_v22 = vpop.eup %1496 }
 0xc0a   :  { %v874_v23 = vmul.f32 %v1497_v22, %v872_v43  ;;  %v1499_v9 = vpop.eup %1498  ;;  %vm879_vm11 = vweird.f32 %v1497_v22 }
 0xc0b   :  { %v813_v24 = vmul.f32 %v1499_v9, %v811_v21  ;;  %vm880_vm13 = vmor %vm878_vm12, %vm879_vm11  ;;  %vm818_vm1 = vweird.f32 %v1499_v9 }
 0xc0c   :  { %v875_v53 = vsub.f32 1.0, %v874_v23  ;;  %vm819_vm3 = vmor %vm817_vm2, %vm818_vm1 }
 0xc0d   :  { %v814_v26 = vsub.f32 1.0, %v813_v24 }
 0xc0e   :  { %v876_v25 = vmul.f32 %v1497_v22, %v875_v53 }
 0xc0f   :  { %v815_v31 = vmul.f32 %v1499_v9, %v814_v26 }
 0xc10   :  { %v877_v27 = vadd.f32 %v1497_v22, %v876_v25 }
 0xc11   :  { %v816_v44 = vadd.f32 %v1499_v9, %v815_v31 }
 0xc12   :  { %v881_v33 = vsel %vm880_vm13, %v1497_v22, %v877_v27 }
 0xc13   :  { %v886_v32 = vsel %vm883_vm14, %v885_v38, %v881_v33  ;;  %v820_v52 = vsel %vm819_vm3, %v1499_v9, %v816_v44 }
 0xc14   :  { %v825_v30 = vsel %vm822_vm4, %v824_v54, %v820_v52  ;;  %v892_v39 = vmul.f32 %v890_v58, %v886_v32 }
 0xc15   :  { %v828_v48 = vmul.f32 %v825_v30, %v1875_v12 }
 0xc6c   :  { %v895_v45 = vpop.permute.xlu0 %894 }
 0xc6d   :  { %v897_v47 = vmul.f32 %v895_v45, %v886_v32 }
 0xc6f   :  { %899 = vrot.lane.b32.xlu2 %v897_v47, %s1546_s25 }
 0xc72   :  { %v831_v56 = vpop.permute.xlu1 %830 }
 0xc73   :  { %v833_v57 = vmul.f32 %v831_v56, %v825_v30 }
 0xc75   :  { %835 = vrot.lane.b32.xlu0 %v833_v57, %s1546_s25 }
 0xcc9   :  { %v900_v61 = vpop.permute.xlu2 %899 }
 0xcca   :  { %v1908_v62 = vadd.f32 %v900_v61, %v892_v39 }
 0xccc   :  { %1500 = vtanh.f32 %v1908_v62  ;;  %v1043_v47 = vrot.slane %v1908_v62, 6 }
 0xcd2   :  { %v1501_v0 = vpop.eup %1500 }
 0xcd3   :  { %905 = vrot.lane.b32.xlu1 %v1501_v0, %s1546_s25 }
 0xce7   :  { %v836_v2 = vpop.permute.xlu0 %835 }
 0xce8   :  { %v1913_v4 = vadd.f32 %v836_v2, %v828_v48 }
 0xcea   :  { %1502 = vtanh.f32 %v1913_v4 }
 0xcf0   :  { %v1503_v6 = vpop.eup %1502 }
 0xcf1   :  { %841 = vrot.lane.b32.xlu2 %v1503_v6, %s1546_s25 }
 0xd45   :  { %v906_v8 = vpop.permute.xlu1 %905 }
 0xd46   :  { %v908_v10 = vmul.f32 %v906_v8, %v886_v32 }
 0xd48   :  { %v910_v55 = vrot.slane %v908_v10, 2 }
 0xd4a   :  { %911 = vrot.lane.b32.xlu0 %v910_v55, %s1547_s4 }
 0xd4b   :  { %v842_v14 = vpop.permute.xlu2 %841 }
 0xd4c   :  { %v1918_v50 = vmul.f32 %v842_v14, %v825_v30 }
 0xd4e   :  { %936 = vrot.lane.b32.xlu1 %v1918_v50, %s1547_s4 }
 0xdbc   :  { %v912_v12 = vpop.permute.xlu0 %911 }
 0xdbd   :  { %1395 = vmatmul.msk.f32.vlgmr.msrb.gmra.mxu2 %vm89_vm5, %v912_v12  ;;  %1398 = vmatmul.msk.f32.vlgmr.msra.gmra.mxu0 %vm89_vm5, %v912_v12 }
 0xdc0   :  { %v937_v59 = vpop.permute.xlu1 %936 }
 0xdc1   :  { %1396 = vmatmul.msk.f32.vlgmr.msrb.gmra.mxu3 %vm89_vm5, %v937_v59  ;;  %v1954_v59 = vld [vmem:[%s2013_s6] ss:$0 sm:$0xff] }
 0xe3a   :  { %v1015_v15 = vpop.f32.mrf.mxu0 }
 0xe3b   :  { %v1019_v16 = vrot.slane %v1015_v15, 4 }
 0xe3d   :  { %v1021_v11 = vadd.f32 %v1019_v16, %v1862_v60 }
 0xe3f   :  { %1504 = vtanh.f32 %v1021_v11  ;;  %v1399_v40 = vmul.f32 -1.442695, %v1021_v11 }
 0xe40   :  { %v932_v63 = vpop.f32.mrf.mxu2 }
 0xe41   :  { %v933_v18 = vadd.f32 %v1743_v49, %v932_v63 }
 0xe44   :  { %v957_v19 = vpop.f32.mrf.mxu3 }
 0xe45   :  { %v1505_v1 = vpop.eup %1504  ;;  %v960_v3 = vadd.f32 %v957_v19, %v933_v18 }
 0xe46   :  { %1047 = vrot.lane.b32.xlu2 %v1505_v1, %s1546_s25 }
 0xe47   :  { %1506 = vtanh.f32 %v960_v3  ;;  %v1397_v36 = vmul.f32 -1.442695, %v960_v3 }
 0xe48   :  { %1508 = vpow2.f32 %v1399_v40 }
 0xe4d   :  { %v1507_v34 = vpop.eup %1506 }
 0xe4e   :  { %983 = vrot.lane.b32.xlu0 %v1507_v34, %s1546_s25  ;;  %v1509_v5 = vpop.eup %1508 }
 0xe4f   :  { %v1025_v41 = vadd.f32 1.0, %v1509_v5 }
 0xe51   :  { %1510 = vrcp.f32 %v1025_v41  ;;  %v1037_v42 = vand.u32 2147483648, %v1025_v41  ;;  %vm1031_vm7 = vweird.f32 %v1025_v41  ;;  %v1035_v43 = vand.u32 2147483647, %v1025_v41 }
 0xe52   :  { %1512 = vpow2.f32 %v1397_v36 }
 0xe53   :  { %v1038_v22 = vor.u32 1.1754944e-38, %v1037_v42  ;;  %vm1036_vm9 = vcmp.eq.f32.partialorder %v1035_v43, 8.507059e+37 }
 0xe57   :  { %v1511_v35 = vpop.eup %1510 }
 0xe58   :  { %v1027_v13 = vmul.f32 %v1511_v35, %v1025_v41  ;;  %vm1032_vm6 = vweird.f32 %v1511_v35  ;;  %v1513_v20 = vpop.eup %1512 }
 0xe59   :  { %vm1033_vm8 = vmor %vm1031_vm7, %vm1032_vm6  ;;  %v964_v23 = vadd.f32 1.0, %v1513_v20 }
 0xe5a   :  { %v1028_v7 = vsub.f32 1.0, %v1027_v13 }
 0xe5b   :  { %1514 = vrcp.f32 %v964_v23  ;;  %v976_v31 = vand.u32 2147483648, %v964_v23  ;;  %vm970_vm12 = vweird.f32 %v964_v23  ;;  %v974_v33 = vand.u32 2147483647, %v964_v23 }
 0xe5c   :  { %v1029_v37 = vmul.f32 %v1511_v35, %v1028_v7 }
 0xe5d   :  { %v977_v44 = vor.u32 1.1754944e-38, %v976_v31  ;;  %vm975_vm14 = vcmp.eq.f32.partialorder %v974_v33, 8.507059e+37 }
 0xe5e   :  { %v1030_v49 = vadd.f32 %v1511_v35, %v1029_v37 }
 0xe60   :  { %v1034_v21 = vsel %vm1033_vm8, %v1511_v35, %v1030_v49 }
 0xe61   :  { %v1039_v9 = vsel %vm1036_vm9, %v1038_v22, %v1034_v21  ;;  %v1515_v25 = vpop.eup %1514 }
 0xe62   :  { %v966_v26 = vmul.f32 %v1515_v25, %v964_v23  ;;  %vm971_vm11 = vweird.f32 %v1515_v25  ;;  %v1045_v51 = vmul.f32 %v1043_v47, %v1039_v9 }
 0xe63   :  { %vm972_vm13 = vmor %vm970_vm12, %vm971_vm11 }
 0xe64   :  { %v967_v27 = vsub.f32 1.0, %v966_v26 }
 0xe66   :  { %v968_v28 = vmul.f32 %v1515_v25, %v967_v27 }
 0xe68   :  { %v969_v29 = vadd.f32 %v1515_v25, %v968_v28 }
 0xe6a   :  { %v973_v38 = vsel %vm972_vm13, %v1515_v25, %v969_v29 }
 0xe6b   :  { %v978_v32 = vsel %vm975_vm14, %v977_v44, %v973_v38 }
 0xe6c   :  { %v981_v56 = vmul.f32 %v978_v32, %v1913_v4 }
 0xea0   :  { %v1048_v53 = vpop.permute.xlu2 %1047 }
 0xea1   :  { %v1050_v24 = vmul.f32 %v1048_v53, %v1039_v9 }
 0xea3   :  { %1052 = vrot.lane.b32.xlu1 %v1050_v24, %s1546_s25 }
 0xec0   :  { %v984_v45 = vpop.permute.xlu0 %983 }
 0xec1   :  { %v986_v46 = vmul.f32 %v984_v45, %v978_v32 }
 0xec3   :  { %988 = vrot.lane.b32.xlu2 %v986_v46, %s1546_s25 }
 0xf15   :  { %v1053_v52 = vpop.permute.xlu1 %1052 }
 0xf16   :  { %v1932_v54 = vadd.f32 %v1053_v52, %v1045_v51 }
 0xf18   :  { %1516 = vtanh.f32 %v1932_v54  ;;  %v1196_v33 = vrot.slane %v1932_v54, 6 }
 0xf1d   :  { %v989_v30 = vpop.permute.xlu2 %988 }
 0xf1e   :  { %v1517_v57 = vpop.eup %1516  ;;  %v1936_v58 = vadd.f32 %v989_v30, %v981_v56 }
 0xf1f   :  { %1058 = vrot.lane.b32.xlu0 %v1517_v57, %s1546_s25 }
 0xf20   :  { %1518 = vtanh.f32 %v1936_v58 }
 0xf26   :  { %v1519_v39 = vpop.eup %1518 }
 0xf27   :  { %994 = vrot.lane.b32.xlu1 %v1519_v39, %s1546_s25 }
 0xf91   :  { %v1059_v61 = vpop.permute.xlu0 %1058 }
 0xf92   :  { %v1061_v62 = vmul.f32 %v1059_v61, %v1039_v9 }
 0xf94   :  { %v1063_v0 = vrot.slane %v1061_v62, 4 }
 0xf96   :  { %1064 = vrot.lane.b32.xlu2 %v1063_v0, %s1547_s4 }
 0xf99   :  { %v995_v48 = vpop.permute.xlu1 %994 }
 0xf9a   :  { %v1942_v2 = vmul.f32 %v995_v48, %v978_v32 }
 0xf9c   :  { %1089 = vrot.lane.b32.xlu0 %v1942_v2, %s1547_s4  ;;  %v1310_v57 = vrot.slane %v1942_v2, 6 }
 0xf9e   :  { %v1323_v62 = vsel %vm1317_vm15, %v1918_v50, %v1310_v57 }
 0xff0   :  { %v1065_v4 = vpop.permute.xlu2 %1064 }
 0xff1   :  { %1400 = vmatmul.msk.f32.vlgmr.msrb.gmra.mxu1 %vm89_vm5, %v1065_v4  ;;  %1403 = vmatmul.msk.f32.vlgmr.msra.gmra.mxu3 %vm89_vm5, %v1065_v4 }
0x100e   :  { %v1090_v6 = vpop.permute.xlu0 %1089 }
0x100f   :  { %1401 = vmatmul.msk.f32.vlgmr.msra.gmra.mxu2 %vm89_vm5, %v1090_v6 }
0x106e   :  { %v1085_v12 = vpop.f32.mrf.mxu1 }
0x106f   :  { %v1086_v15 = vadd.f32 %v1954_v59, %v1085_v12 }
0x1074   :  { %v1168_v8 = vpop.f32.mrf.mxu3 }
0x1075   :  { %v1172_v10 = vrot.slane %v1168_v8, 2 }
0x1077   :  { %v1174_v55 = vadd.f32 %v1172_v10, %v1862_v60 }
0x1079   :  { %1520 = vtanh.f32 %v1174_v55  ;;  %v1404_v18 = vmul.f32 -1.442695, %v1174_v55 }
0x107f   :  { %v1521_v14 = vpop.eup %1520 }
0x1080   :  { %1200 = vrot.lane.b32.xlu1 %v1521_v14, %s1546_s25 }
0x1092   :  { %v1110_v16 = vpop.f32.mrf.mxu2 }
0x1093   :  { %v1113_v11 = vadd.f32 %v1110_v16, %v1086_v15  ;;  %v52_v15 = vld [vmem:[%s2014_s7 + $0x18] sm:$0xff]  ;;  %v50_v16 = vld [vmem:[%s2014_s7 + $0x8] sm:$0xff] }
0x1094   :  { %1351 = vmatpush.msrb.mxu2 %v52_v15 }
0x1095   :  { %1522 = vtanh.f32 %v1113_v11  ;;  %v1402_v60 = vmul.f32 -1.442695, %v1113_v11 }
0x1096   :  { %1524 = vpow2.f32 %v1404_v18 }
0x1097   :  { %1526 = vpow2.f32 %v1402_v60 }
0x109b   :  { %v1523_v63 = vpop.eup %1522 }
0x109c   :  { %1136 = vrot.lane.b32.xlu2 %v1523_v63, %s1546_s25  ;;  %v1525_v19 = vpop.eup %1524 }
0x109d   :  { %v1178_v1 = vadd.f32 1.0, %v1525_v19  ;;  %v1527_v3 = vpop.eup %1526 }
0x109e   :  { %v1117_v34 = vadd.f32 1.0, %v1527_v3 }
0x109f   :  { %1528 = vrcp.f32 %v1178_v1  ;;  %v1190_v42 = vand.u32 2147483648, %v1178_v1  ;;  %vm1184_vm2 = vweird.f32 %v1178_v1  ;;  %v1188_v43 = vand.u32 2147483647, %v1178_v1 }
0x10a0   :  { %1530 = vrcp.f32 %v1117_v34  ;;  %v1129_v23 = vand.u32 2147483648, %v1117_v34  ;;  %vm1123_vm7 = vweird.f32 %v1117_v34  ;;  %v1127_v9 = vand.u32 2147483647, %v1117_v34 }
0x10a1   :  { %v1191_v22 = vor.u32 1.1754944e-38, %v1190_v42  ;;  %vm1189_vm6 = vcmp.eq.f32.partialorder %v1188_v43, 8.507059e+37  ;;  %v1415_v42 = vld [vmem:[%s2015_s8] ss:$0 sm:$0xff] }
0x10a2   :  { %v1130_v27 = vor.u32 1.1754944e-38, %v1129_v23  ;;  %vm1128_vm9 = vcmp.eq.f32.partialorder %v1127_v9, 8.507059e+37 }
0x10a5   :  { %v1529_v40 = vpop.eup %1528 }
0x10a6   :  { %v1180_v5 = vmul.f32 %v1529_v40, %v1178_v1  ;;  %v1531_v41 = vpop.eup %1530  ;;  %vm1185_vm1 = vweird.f32 %v1529_v40 }
0x10a7   :  { %v1119_v13 = vmul.f32 %v1531_v41, %v1117_v34  ;;  %vm1186_vm3 = vmor %vm1184_vm2, %vm1185_vm1  ;;  %vm1124_vm4 = vweird.f32 %v1531_v41 }
0x10a8   :  { %v1181_v35 = vsub.f32 1.0, %v1180_v5  ;;  %vm1125_vm8 = vmor %vm1123_vm7, %vm1124_vm4 }
0x10a9   :  { %v1120_v36 = vsub.f32 1.0, %v1119_v13 }
0x10aa   :  { %v1182_v7 = vmul.f32 %v1529_v40, %v1181_v35 }
0x10ab   :  { %v1121_v49 = vmul.f32 %v1531_v41, %v1120_v36 }
0x10ac   :  { %v1183_v37 = vadd.f32 %v1529_v40, %v1182_v7 }
0x10ad   :  { %v1122_v21 = vadd.f32 %v1531_v41, %v1121_v49 }
0x10ae   :  { %v1187_v20 = vsel %vm1186_vm3, %v1529_v40, %v1183_v37 }
0x10af   :  { %v1192_v24 = vsel %vm1189_vm6, %v1191_v22, %v1187_v20  ;;  %v1126_v26 = vsel %vm1125_vm8, %v1531_v41, %v1122_v21 }
0x10b0   :  { %v1131_v29 = vsel %vm1128_vm9, %v1130_v27, %v1126_v26  ;;  %v1198_v38 = vmul.f32 %v1196_v33, %v1192_v24 }
0x10b1   :  { %v1134_v32 = vmul.f32 %v1131_v29, %v1936_v58 }
0x10f2   :  { %v1201_v53 = vpop.permute.xlu1 %1200 }
0x10f3   :  { %v1203_v25 = vmul.f32 %v1201_v53, %v1192_v24 }
0x10f5   :  { %1205 = vrot.lane.b32.xlu0 %v1203_v25, %s1546_s25 }
0x10f6   :  { %v1137_v28 = vpop.permute.xlu2 %1136 }
0x10f7   :  { %v1139_v31 = vmul.f32 %v1137_v28, %v1131_v29 }
0x10f9   :  { %1141 = vrot.lane.b32.xlu1 %v1139_v31, %s1546_s25 }
0x1167   :  { %v1206_v44 = vpop.permute.xlu0 %1205 }
0x1168   :  { %v1208_v45 = vadd.f32 %v1206_v44, %v1198_v38 }
0x116a   :  { %1532 = vtanh.f32 %v1208_v45 }
0x116b   :  { %v1142_v46 = vpop.permute.xlu1 %1141 }
0x116c   :  { %v1962_v47 = vadd.f32 %v1142_v46, %v1134_v32 }
0x116e   :  { %1534 = vtanh.f32 %v1962_v47 }
0x1170   :  { %v1533_v51 = vpop.eup %1532 }
0x1171   :  { %1211 = vrot.lane.b32.xlu2 %v1533_v51, %s1546_s25 }
0x1174   :  { %v1535_v52 = vpop.eup %1534 }
0x1175   :  { %1147 = vrot.lane.b32.xlu0 %v1535_v52, %s1546_s25 }
0x11cb   :  { %v1212_v56 = vpop.permute.xlu2 %1211 }
0x11cc   :  { %v1214_v30 = vmul.f32 %v1212_v56, %v1192_v24 }
0x11ce   :  { %v1216_v54 = vrot.slane %v1214_v30, 6 }
0x11d0   :  { %1217 = vrot.lane.b32.xlu1 %v1216_v54, %s1547_s4 }
0x11e7   :  { %v1148_v39 = vpop.permute.xlu0 %1147 }
0x11e8   :  { %v1150_v58 = vmul.f32 %v1148_v39, %v1131_v29 }
0x11ea   :  { %v1312_v61 = vrot.slane %v1150_v58, 4  ;;  %1242 = vrot.lane.b32.xlu2 %v1150_v58, %s1547_s4 }
0x11ec   :  { %v1324_v0 = vsel %vm1319_vm0, %v1323_v62, %v1312_v61 }
0x1242   :  { %v1218_v48 = vpop.permute.xlu1 %1217 }
0x1243   :  { %1405 = vmatmul.msk.f32.vlgmr.msrb.gmra.mxu0 %vm89_vm5, %v1218_v48 }
0x1244   :  { %v1243_v4 = vpop.permute.xlu2 %1242 }
0x1245   :  { %1406 = vmatmul.msk.f32.vlgmr.msra.gmra.mxu1 %vm89_vm5, %v1243_v4 }
0x12c0   :  { %v1238_v6 = vpop.f32.mrf.mxu0 }
0x12c1   :  { %v1239_v8 = vadd.f32 %v1954_v59, %v1238_v6  ;;  %v51_v59 = vld [vmem:[%s2014_s7 + $0x10] sm:$0xff] }
0x12c2   :  { %v1263_v2 = vpop.f32.mrf.mxu1  ;;  %1352 = vmatpush.msrb.mxu2 %v51_v59 }
0x12c3   :  { %v1266_v10 = vadd.f32 %v1263_v2, %v1239_v8 }
0x12c4   :  { %1353 = vmatpush.msrb.mxu2 %v50_v16 }
0x12c5   :  { %1536 = vtanh.f32 %v1266_v10  ;;  %v1407_v50 = vmul.f32 -1.442695, %v1266_v10 }
0x12c7   :  { %1538 = vpow2.f32 %v1407_v50 }
0x12cb   :  { %v1537_v55 = vpop.eup %1536 }
0x12cc   :  { %1289 = vrot.lane.b32.xlu0 %v1537_v55, %s1546_s25 }
0x12cd   :  { %v1539_v14 = vpop.eup %1538 }
0x12ce   :  { %v1270_v12 = vadd.f32 1.0, %v1539_v14 }
0x12d0   :  { %1540 = vrcp.f32 %v1270_v12  ;;  %v1282_v1 = vand.u32 2147483648, %v1270_v12  ;;  %vm1276_vm0 = vweird.f32 %v1270_v12  ;;  %v1280_v3 = vand.u32 2147483647, %v1270_v12 }
0x12d2   :  { %v1283_v40 = vor.u32 1.1754944e-38, %v1282_v1  ;;  %vm1281_vm12 = vcmp.eq.f32.partialorder %v1280_v3, 8.507059e+37 }
0x12d4   :  { %1331 = vrot.lane.b32.xlu0 %v1884_v17, %s1547_s4  ;;  %v49_v17 = vld [vmem:[%s2014_s7] sm:$0xff] }
0x12d5   :  { %1354 = vmatpush.msrb.mxu2 %v49_v17 }
0x12d6   :  { %v1541_v11 = vpop.eup %1540 }
0x12d7   :  { %v1272_v63 = vmul.f32 %v1541_v11, %v1270_v12  ;;  %vm1277_vm15 = vweird.f32 %v1541_v11 }
0x12d8   :  { %vm1278_vm11 = vmor %vm1276_vm0, %vm1277_vm15 }
0x12d9   :  { %v1273_v18 = vsub.f32 1.0, %v1272_v63 }
0x12db   :  { %v1274_v60 = vmul.f32 %v1541_v11, %v1273_v18 }
0x12dd   :  { %v1275_v19 = vadd.f32 %v1541_v11, %v1274_v60 }
0x12df   :  { %v1279_v34 = vsel %vm1278_vm11, %v1541_v11, %v1275_v19 }
0x12e0   :  { %v1284_v41 = vsel %vm1281_vm12, %v1283_v40, %v1279_v34 }
0x12e1   :  { %v1287_v7 = vmul.f32 %v1284_v41, %v1962_v47 }
0x133e   :  { %v1290_v5 = vpop.permute.xlu0 %1289 }
0x133f   :  { %v1292_v35 = vmul.f32 %v1290_v5, %v1284_v41 }
0x1341   :  { %1294 = vrot.lane.b32.xlu1 %v1292_v35, %s1546_s25 }
0x1346   :  { %v1332_v13 = vpop.permute.xlu0 %1331 }
0x1347   :  { %1408 = vmatmul.msk.f32.vlgmr.msrb.gmra.mxu2 %vm89_vm5, %v1332_v13 }
0x13b3   :  { %v1295_v36 = vpop.permute.xlu1 %1294 }
0x13b4   :  { %v1297_v37 = vadd.f32 %v1295_v36, %v1287_v7 }
0x13b6   :  { %1542 = vtanh.f32 %v1297_v37 }
0x13bc   :  { %v1543_v49 = vpop.eup %1542 }
0x13bd   :  { %1300 = vrot.lane.b32.xlu2 %v1543_v49, %s1546_s25 }
0x13ca   :  { %v1356_v43 = vpop.f32.mrf.mxu2 }
0x13cb   :  { %v1357_v20 = vadd.f32 %v1415_v42, %v1356_v43 }
0x13cd   :  { %1362 = vst [vmem:[%s2016_s9] sm:$0xff] %v1357_v20 }
0x1417   :  { %v1301_v21 = vpop.permute.xlu2 %1300 }
0x1418   :  { %v1303_v22 = vmul.f32 %v1301_v21, %v1284_v41 }
0x141a   :  { %v1315_v23 = vrot.slane %v1303_v22, 2 }
0x141c   :  { %v1325_v9 = vsel %vm1321_vm10, %v1324_v0, %v1315_v23 }
0x141d   :  { %1333 = vrot.lane.b32.xlu1 %v1325_v9, %s1547_s4 }
0x148f   :  { %v1334_v53 = vpop.permute.xlu1 %1333 }
0x1490   :  { %1409 = vmatmul.msk.f32.gmra.mxu2 %vm89_vm5, %v1334_v53 }
0x1513   :  { %v1359_v24 = vpop.f32.mrf.mxu2 }
0x1514   :  { %v1360_v25 = vadd.f32 %v1415_v42, %v1359_v24 }
0x1516   :  { %1363 = vst [vmem:[%s2016_s9 + $0x8] sm:$0xff] %v1360_v25 }

</bundles_post_ra>
